<compile_context>
chip_gen: v6e
topology: v6e:2x2x1
jax: 0.10.0
libtpu: 0.0.40
codegen_flags: <defaults>
</compile_context>

<pallas_src>
import functools

import jax
import jax.numpy as jnp
from jax.experimental import pallas as pl
from jax.experimental.pallas import tpu as pltpu


def _resnet_block_kernel(*refs, H, W, groups, eps, skip_scale, has_shortcut_conv):
    if has_shortcut_conv:
        (x_ref, row_ref, col_ref,
         gamma1_ref, beta1_ref, w1_ref, b1_ref,
         gamma2_ref, beta2_ref, w2_ref, b2_ref,
         ws_ref, bs_ref, o_ref) = refs
    else:
        (x_ref, row_ref, col_ref,
         gamma1_ref, beta1_ref, w1_ref, b1_ref,
         gamma2_ref, beta2_ref, w2_ref, b2_ref,
         o_ref) = refs
        ws_ref = bs_ref = None

    HW = H * W
    x = x_ref[0].astype(jnp.float32)          # (Cin, HW) residual input
    row = row_ref[...]                        # (1, HW) i32  pixel row index y
    col = col_ref[...]                        # (1, HW) i32  pixel col index x

    # Border masks for the 9 taps of a pad=1 3x3 conv.  Hoisted out of the
    # conv helper so they are built once and reused by both convolutions.
    tap_masks = []
    for ky in range(3):
        for kx in range(3):
            oy, ox = ky - 1, kx - 1
            conds = []
            if oy < 0:
                conds.append(row >= -oy)
            if oy > 0:
                conds.append(row < H - oy)
            if ox < 0:
                conds.append(col >= -ox)
            if ox > 0:
                conds.append(col < W - ox)
            m = None
            for c in conds:
                m = c if m is None else (m & c)
            tap_masks.append((oy * W + ox, m))   # out[p] = h[p + delta], masked

    def group_avg(v, oh, oh_t, inv_n):
        # v: (C, 1) per-channel sums -> per-channel *group* means, shape (C, 1).
        g = jnp.dot(oh_t, v, preferred_element_type=jnp.float32)     # (groups, 1)
        return jnp.dot(oh, g, preferred_element_type=jnp.float32) * inv_n

    def group_norm(h, gamma_ref, beta_ref):
        # Two-pass (mean, then centered variance) GroupNorm, all in f32.
        C = h.shape[0]
        cg = C // groups
        inv_n = 1.0 / (cg * HW)
        # One-hot group membership built from iota (no division, no (C,C) input).
        ch = jax.lax.broadcasted_iota(jnp.int32, (C, groups), 0)
        gs = jax.lax.broadcasted_iota(jnp.int32, (C, groups), 1) * cg
        oh = ((ch >= gs) & (ch < gs + cg)).astype(jnp.float32)          # (C, groups)
        ch_t = jax.lax.broadcasted_iota(jnp.int32, (groups, C), 1)
        gs_t = jax.lax.broadcasted_iota(jnp.int32, (groups, C), 0) * cg
        oh_t = ((ch_t >= gs_t) & (ch_t < gs_t + cg)).astype(jnp.float32)  # (groups, C)

        mean = group_avg(jnp.sum(h, axis=1, keepdims=True), oh, oh_t, inv_n)
        cen = h - mean
        var = group_avg(jnp.sum(cen * cen, axis=1, keepdims=True), oh, oh_t, inv_n)
        hn = cen * jax.lax.rsqrt(var + eps)
        return hn * gamma_ref[...] + beta_ref[...]

    def silu(h):
        return h * jax.nn.sigmoid(h)             # sigmoid -> EUP slot (near free)

    def conv3x3(h, w_ref, b_ref):
        # im2col: 9 lane-rolled + border-masked taps stacked along the
        # contraction axis, then ONE bf16 MXU matmul (Cout, 9*C) @ (9*C, HW).
        taps = []
        for delta, m in tap_masks:
            t = h if delta == 0 else pltpu.roll(h, shift=(-delta) % HW, axis=1)
            if m is not None:
                t = jnp.where(m, t, 0.0)
            taps.append(t.astype(jnp.bfloat16))
        im2col = jnp.concatenate(taps, axis=0)    # (9*C, HW) bf16
        out = jnp.dot(w_ref[...], im2col, preferred_element_type=jnp.float32)
        return out + b_ref[...]

    # norm1 -> silu -> conv1 ; norm2 -> silu -> conv2
    h = conv3x3(silu(group_norm(x, gamma1_ref, beta1_ref)), w1_ref, b1_ref)
    h = conv3x3(silu(group_norm(h, gamma2_ref, beta2_ref)), w2_ref, b2_ref)

    # Shortcut: 1x1 conv when Cin != Cout, identity otherwise.
    if has_shortcut_conv:
        sc = jnp.dot(ws_ref[...], x.astype(jnp.bfloat16),
                     preferred_element_type=jnp.float32) + bs_ref[...]
    else:
        sc = x
    o_ref[0] = ((h + sc) * skip_scale).astype(o_ref.dtype)


def resnet_block_forward(x_nchw, params, *, groups, eps=1e-5, skip_scale=1.0):
    """Fused ResnetBlock forward. Input/output are NCHW (PyTorch layout)."""
    N, Cin, H, W = x_nchw.shape
    Cout = params["w1"].shape[-1]
    HW = H * W
    assert Cin % groups == 0 and Cout % groups == 0
    has_shortcut_conv = "ws" in params
    assert has_shortcut_conv or Cin == Cout

    # Free layout change only (flatten spatial dims); no activation transposes.
    x = x_nchw.reshape(N, Cin, HW).astype(jnp.float32)

    # Conv weights: HWIO -> (Cout, 9*C) bf16 for the single im2col matmul.
    w1 = (params["w1"].reshape(9, Cin, Cout).transpose(2, 0, 1)
          .reshape(Cout, 9 * Cin).astype(jnp.bfloat16))
    w2 = (params["w2"].reshape(9, Cout, Cout).transpose(2, 0, 1)
          .reshape(Cout, 9 * Cout).astype(jnp.bfloat16))

    as_col = lambda v: v.reshape(-1, 1).astype(jnp.float32)

    # Pixel row / col indices for the 3x3 border masks (tiny i32 inputs).
    pix = jnp.arange(HW, dtype=jnp.int32)
    row_idx = (pix // W).reshape(1, HW)
    col_idx = (pix % W).reshape(1, HW)

    kernel = functools.partial(_resnet_block_kernel, H=H, W=W, groups=groups,
                               eps=eps, skip_scale=skip_scale,
                               has_shortcut_conv=has_shortcut_conv)

    def const_spec(shape):
        return pl.BlockSpec(shape, lambda b, _n=len(shape): (0,) * _n)

    in_specs = [
        pl.BlockSpec((1, Cin, HW), lambda b: (b, 0, 0)),
        const_spec((1, HW)), const_spec((1, HW)),
        const_spec((Cin, 1)), const_spec((Cin, 1)),
        const_spec((Cout, 9 * Cin)), const_spec((Cout, 1)),
        const_spec((Cout, 1)), const_spec((Cout, 1)),
        const_spec((Cout, 9 * Cout)), const_spec((Cout, 1)),
    ]
    inputs = [
        x, row_idx, col_idx,
        as_col(params["gamma1"]), as_col(params["beta1"]), w1, as_col(params["b1"]),
        as_col(params["gamma2"]), as_col(params["beta2"]), w2, as_col(params["b2"]),
    ]
    if has_shortcut_conv:
        in_specs += [const_spec((Cout, Cin)), const_spec((Cout, 1))]
        inputs += [params["ws"].T.astype(jnp.bfloat16), as_col(params["bs"])]

    out = pl.pallas_call(
        kernel,
        out_shape=jax.ShapeDtypeStruct((N, Cout, HW), jnp.float32),
        grid_spec=pltpu.PrefetchScalarGridSpec(
            num_scalar_prefetch=0,
            grid=(N,),                                   # one image per grid step
            in_specs=in_specs,
            out_specs=pl.BlockSpec((1, Cout, HW), lambda b: (b, 0, 0)),
        ),
        compiler_params=pltpu.CompilerParams(dimension_semantics=("parallel",)),
    )(*inputs)
    return out.reshape(N, Cout, H, W)                    # free reshape, still NCHW


def ref_forward(x_nchw, params, *, groups, eps=1e-5, skip_scale=1.0):
    """Pure-JAX f32 reference (mirrors the PyTorch forward, default resample)."""
    x = jnp.transpose(x_nchw, (0, 2, 3, 1)).astype(jnp.float32)

    def gn(h, gamma, beta):
        n, hh, ww, c = h.shape
        cg = c // groups
        hr = h.reshape(n, hh, ww, groups, cg)
        mean = hr.mean(axis=(1, 2, 4), keepdims=True)
        var = ((hr - mean) ** 2).mean(axis=(1, 2, 4), keepdims=True)
        hn = ((hr - mean) / jnp.sqrt(var + eps)).reshape(n, hh, ww, c)
        return hn * gamma + beta

    def conv3(h, w, b):
        return jax.lax.conv_general_dilated(
            h, w, window_strides=(1, 1), padding=((1, 1), (1, 1)),
            dimension_numbers=("NHWC", "HWIO", "NHWC")) + b

    h = gn(x, params["gamma1"], params["beta1"])
    h = jax.nn.silu(h)
    h = conv3(h, params["w1"], params["b1"])
    h = gn(h, params["gamma2"], params["beta2"])
    h = jax.nn.silu(h)
    h = conv3(h, params["w2"], params["b2"])
    if "ws" in params:
        sc = jnp.einsum("nhwc,co->nhwo", x, params["ws"]) + params["bs"]
    else:
        sc = x
    out = (h + sc) * skip_scale
    return jnp.transpose(out, (0, 3, 1, 2))


if __name__ == "__main__":
    # Small shapes consistent with the module (in != out channels -> 1x1 shortcut).
    N, Cin, Cout, H, W = 2, 16, 32, 16, 16
    groups, eps, skip_scale = 8, 1e-5, 1.0

    key = jax.random.PRNGKey(0)
    ks = jax.random.split(key, 11)
    params = {
        "gamma1": 1.0 + 0.1 * jax.random.normal(ks[0], (Cin,), jnp.float32),
        "beta1": 0.1 * jax.random.normal(ks[1], (Cin,), jnp.float32),
        "w1": 0.1 * jax.random.normal(ks[2], (3, 3, Cin, Cout), jnp.float32),   # HWIO
        "b1": 0.05 * jax.random.normal(ks[3], (Cout,), jnp.float32),
        "gamma2": 1.0 + 0.1 * jax.random.normal(ks[4], (Cout,), jnp.float32),
        "beta2": 0.1 * jax.random.normal(ks[5], (Cout,), jnp.float32),
        "w2": 0.1 * jax.random.normal(ks[6], (3, 3, Cout, Cout), jnp.float32),  # HWIO
        "b2": 0.05 * jax.random.normal(ks[7], (Cout,), jnp.float32),
        "ws": 0.1 * jax.random.normal(ks[8], (Cin, Cout), jnp.float32),         # 1x1 IO
        "bs": 0.05 * jax.random.normal(ks[9], (Cout,), jnp.float32),
    }
    x = jax.random.normal(ks[10], (N, Cin, H, W), jnp.float32)   # NCHW like PyTorch

    out = resnet_block_forward(x, params, groups=groups, eps=eps, skip_scale=skip_scale)
    out = jax.block_until_ready(out)

    ref = jax.block_until_ready(
        ref_forward(x, params, groups=groups, eps=eps, skip_scale=skip_scale))

    assert out.shape == (N, Cout, H, W), out.shape
    max_err = float(jnp.max(jnp.abs(out - ref)))
    # bf16 MXU operands (f32 accumulation) -> allow a bf16-sized tolerance.
    assert max_err < 5e-2, f"mismatch vs f32 reference: max abs err = {max_err}"

    print("KERNEL_OK")
</pallas_src>

<mosaic_0001>
module attributes {stable_mosaic.version = 11 : i64} {
  func.func @_resnet_block_kernel(%arg0: i32, %arg1: memref<1x16x256xf32, #tpu.memory_space<vmem>>, %arg2: memref<1x256xi32, #tpu.memory_space<vmem>>, %arg3: memref<1x256xi32, #tpu.memory_space<vmem>>, %arg4: memref<16x1xf32, #tpu.memory_space<vmem>>, %arg5: memref<16x1xf32, #tpu.memory_space<vmem>>, %arg6: memref<32x144xbf16, #tpu.memory_space<vmem>>, %arg7: memref<32x1xf32, #tpu.memory_space<vmem>>, %arg8: memref<32x1xf32, #tpu.memory_space<vmem>>, %arg9: memref<32x1xf32, #tpu.memory_space<vmem>>, %arg10: memref<32x288xbf16, #tpu.memory_space<vmem>>, %arg11: memref<32x1xf32, #tpu.memory_space<vmem>>, %arg12: memref<32x16xbf16, #tpu.memory_space<vmem>>, %arg13: memref<32x1xf32, #tpu.memory_space<vmem>>, %arg14: memref<1x32x256xf32, #tpu.memory_space<vmem>>) attributes {dimension_semantics = [#tpu.dimension_semantics<parallel>], iteration_bounds = array<i64: 2>, scalar_prefetch = 0 : i64, scratch_operands = 0 : i64, tpu.core_type = #tpu.core_type<tc>, window_params = [{transform_indices = @transform_0, window_bounds = array<i64: 1, 16, 256>}, {pipeline_mode = #tpu.pipeline_mode<synchronous>, transform_indices = @transform_1, window_bounds = array<i64: 1, 256>}, {pipeline_mode = #tpu.pipeline_mode<synchronous>, transform_indices = @transform_2, window_bounds = array<i64: 1, 256>}, {pipeline_mode = #tpu.pipeline_mode<synchronous>, transform_indices = @transform_3, window_bounds = array<i64: 16, 1>}, {pipeline_mode = #tpu.pipeline_mode<synchronous>, transform_indices = @transform_4, window_bounds = array<i64: 16, 1>}, {pipeline_mode = #tpu.pipeline_mode<synchronous>, transform_indices = @transform_5, window_bounds = array<i64: 32, 144>}, {pipeline_mode = #tpu.pipeline_mode<synchronous>, transform_indices = @transform_6, window_bounds = array<i64: 32, 1>}, {pipeline_mode = #tpu.pipeline_mode<synchronous>, transform_indices = @transform_7, window_bounds = array<i64: 32, 1>}, {pipeline_mode = #tpu.pipeline_mode<synchronous>, transform_indices = @transform_8, window_bounds = array<i64: 32, 1>}, {pipeline_mode = #tpu.pipeline_mode<synchronous>, transform_indices = @transform_9, window_bounds = array<i64: 32, 288>}, {pipeline_mode = #tpu.pipeline_mode<synchronous>, transform_indices = @transform_10, window_bounds = array<i64: 32, 1>}, {pipeline_mode = #tpu.pipeline_mode<synchronous>, transform_indices = @transform_11, window_bounds = array<i64: 32, 16>}, {pipeline_mode = #tpu.pipeline_mode<synchronous>, transform_indices = @transform_12, window_bounds = array<i64: 32, 1>}, {transform_indices = @transform_13, window_bounds = array<i64: 1, 32, 256>}]} {
    %c0 = arith.constant 0 : index
    %c0_0 = arith.constant 0 : index
    %c0_1 = arith.constant 0 : index
    %0 = vector.load %arg1[%c0, %c0_0, %c0_1] : memref<1x16x256xf32, #tpu.memory_space<vmem>>, vector<1x16x256xf32>
    %1 = vector.shape_cast %0 : vector<1x16x256xf32> to vector<16x256xf32>
    %c0_2 = arith.constant 0 : index
    %c0_3 = arith.constant 0 : index
    %2 = vector.load %arg2[%c0_2, %c0_3] : memref<1x256xi32, #tpu.memory_space<vmem>>, vector<1x256xi32>
    %c0_4 = arith.constant 0 : index
    %c0_5 = arith.constant 0 : index
    %3 = vector.load %arg3[%c0_4, %c0_5] : memref<1x256xi32, #tpu.memory_space<vmem>>, vector<1x256xi32>
    %c1_i32 = arith.constant 1 : i32
    %4 = vector.broadcast %c1_i32 : i32 to vector<1x256xi32>
    %5 = arith.cmpi sge, %2, %4 : vector<1x256xi32>
    %c1_i32_6 = arith.constant 1 : i32
    %6 = vector.broadcast %c1_i32_6 : i32 to vector<1x256xi32>
    %7 = arith.cmpi sge, %3, %6 : vector<1x256xi32>
    %8 = arith.andi %5, %7 : vector<1x256xi1>
    %c1_i32_7 = arith.constant 1 : i32
    %9 = vector.broadcast %c1_i32_7 : i32 to vector<1x256xi32>
    %10 = arith.cmpi sge, %2, %9 : vector<1x256xi32>
    %c1_i32_8 = arith.constant 1 : i32
    %11 = vector.broadcast %c1_i32_8 : i32 to vector<1x256xi32>
    %12 = arith.cmpi sge, %2, %11 : vector<1x256xi32>
    %c15_i32 = arith.constant 15 : i32
    %13 = vector.broadcast %c15_i32 : i32 to vector<1x256xi32>
    %14 = arith.cmpi slt, %3, %13 : vector<1x256xi32>
    %15 = arith.andi %12, %14 : vector<1x256xi1>
    %c1_i32_9 = arith.constant 1 : i32
    %16 = vector.broadcast %c1_i32_9 : i32 to vector<1x256xi32>
    %17 = arith.cmpi sge, %3, %16 : vector<1x256xi32>
    %c15_i32_10 = arith.constant 15 : i32
    %18 = vector.broadcast %c15_i32_10 : i32 to vector<1x256xi32>
    %19 = arith.cmpi slt, %3, %18 : vector<1x256xi32>
    %c15_i32_11 = arith.constant 15 : i32
    %20 = vector.broadcast %c15_i32_11 : i32 to vector<1x256xi32>
    %21 = arith.cmpi slt, %2, %20 : vector<1x256xi32>
    %c1_i32_12 = arith.constant 1 : i32
    %22 = vector.broadcast %c1_i32_12 : i32 to vector<1x256xi32>
    %23 = arith.cmpi sge, %3, %22 : vector<1x256xi32>
    %24 = arith.andi %21, %23 : vector<1x256xi1>
    %c15_i32_13 = arith.constant 15 : i32
    %25 = vector.broadcast %c15_i32_13 : i32 to vector<1x256xi32>
    %26 = arith.cmpi slt, %2, %25 : vector<1x256xi32>
    %c15_i32_14 = arith.constant 15 : i32
    %27 = vector.broadcast %c15_i32_14 : i32 to vector<1x256xi32>
    %28 = arith.cmpi slt, %2, %27 : vector<1x256xi32>
    %c15_i32_15 = arith.constant 15 : i32
    %29 = vector.broadcast %c15_i32_15 : i32 to vector<1x256xi32>
    %30 = arith.cmpi slt, %3, %29 : vector<1x256xi32>
    %31 = arith.andi %28, %30 : vector<1x256xi1>
    %32 = tpu.iota {dimensions = array<i32: 0>} : vector<16x8xi32>
    %33 = tpu.iota {dimensions = array<i32: 1>} : vector<16x8xi32>
    %c2_i32 = arith.constant 2 : i32
    %34 = vector.broadcast %c2_i32 : i32 to vector<16x8xi32>
    %35 = arith.muli %33, %34 : vector<16x8xi32>
    %36 = arith.cmpi sge, %32, %35 : vector<16x8xi32>
    %c2_i32_16 = arith.constant 2 : i32
    %37 = vector.broadcast %c2_i32_16 : i32 to vector<16x8xi32>
    %38 = arith.addi %35, %37 : vector<16x8xi32>
    %39 = arith.cmpi slt, %32, %38 : vector<16x8xi32>
    %40 = arith.andi %36, %39 : vector<16x8xi1>
    %41 = arith.extui %40 : vector<16x8xi1> to vector<16x8xi32>
    %42 = arith.sitofp %41 : vector<16x8xi32> to vector<16x8xf32>
    %43 = tpu.iota {dimensions = array<i32: 1>} : vector<8x16xi32>
    %44 = tpu.iota {dimensions = array<i32: 0>} : vector<8x16xi32>
    %c2_i32_17 = arith.constant 2 : i32
    %45 = vector.broadcast %c2_i32_17 : i32 to vector<8x16xi32>
    %46 = arith.muli %44, %45 : vector<8x16xi32>
    %47 = arith.cmpi sge, %43, %46 : vector<8x16xi32>
    %c2_i32_18 = arith.constant 2 : i32
    %48 = vector.broadcast %c2_i32_18 : i32 to vector<8x16xi32>
    %49 = arith.addi %46, %48 : vector<8x16xi32>
    %50 = arith.cmpi slt, %43, %49 : vector<8x16xi32>
    %51 = arith.andi %47, %50 : vector<8x16xi1>
    %52 = arith.extui %51 : vector<8x16xi1> to vector<8x16xi32>
    %53 = arith.sitofp %52 : vector<8x16xi32> to vector<8x16xf32>
    %cst = arith.constant dense<0.000000e+00> : vector<16xf32>
    %54 = vector.multi_reduction <add>, %1, %cst [1] : vector<16x256xf32> to vector<16xf32>
    %55 = vector.shape_cast %54 : vector<16xf32> to vector<16x1xf32>
    %cst_19 = arith.constant dense<0.000000e+00> : vector<8x1xf32>
    %56 = tpu.matmul %53, %55, %cst_19 {dimension_numbers = #tpu.dot_dimension_numbers<[1], [0], [0], [1], [0, 0, 1, 1], [], []>} : vector<8x16xf32>, vector<16x1xf32>, vector<8x1xf32> -> vector<8x1xf32>
    %cst_20 = arith.constant dense<0.000000e+00> : vector<16x1xf32>
    %57 = tpu.matmul %42, %56, %cst_20 {dimension_numbers = #tpu.dot_dimension_numbers<[1], [0], [0], [1], [0, 0, 1, 1], [], []>} : vector<16x8xf32>, vector<8x1xf32>, vector<16x1xf32> -> vector<16x1xf32>
    %cst_21 = arith.constant 0.001953125 : f32
    %58 = vector.broadcast %cst_21 : f32 to vector<16x1xf32>
    %59 = arith.mulf %57, %58 : vector<16x1xf32>
    %60 = vector.broadcast %59 : vector<16x1xf32> to vector<16x256xf32>
    %61 = arith.subf %1, %60 : vector<16x256xf32>
    %62 = arith.mulf %61, %61 : vector<16x256xf32>
    %cst_22 = arith.constant dense<0.000000e+00> : vector<16xf32>
    %63 = vector.multi_reduction <add>, %62, %cst_22 [1] : vector<16x256xf32> to vector<16xf32>
    %64 = vector.shape_cast %63 : vector<16xf32> to vector<16x1xf32>
    %cst_23 = arith.constant dense<0.000000e+00> : vector<8x1xf32>
    %65 = tpu.matmul %53, %64, %cst_23 {dimension_numbers = #tpu.dot_dimension_numbers<[1], [0], [0], [1], [0, 0, 1, 1], [], []>} : vector<8x16xf32>, vector<16x1xf32>, vector<8x1xf32> -> vector<8x1xf32>
    %cst_24 = arith.constant dense<0.000000e+00> : vector<16x1xf32>
    %66 = tpu.matmul %42, %65, %cst_24 {dimension_numbers = #tpu.dot_dimension_numbers<[1], [0], [0], [1], [0, 0, 1, 1], [], []>} : vector<16x8xf32>, vector<8x1xf32>, vector<16x1xf32> -> vector<16x1xf32>
    %cst_25 = arith.constant 0.001953125 : f32
    %67 = vector.broadcast %cst_25 : f32 to vector<16x1xf32>
    %68 = arith.mulf %66, %67 : vector<16x1xf32>
    %cst_26 = arith.constant 9.99999974E-6 : f32
    %69 = vector.broadcast %cst_26 : f32 to vector<16x1xf32>
    %70 = arith.addf %68, %69 : vector<16x1xf32>
    %71 = math.rsqrt %70 : vector<16x1xf32>
    %72 = vector.broadcast %71 : vector<16x1xf32> to vector<16x256xf32>
    %73 = arith.mulf %61, %72 : vector<16x256xf32>
    %c0_27 = arith.constant 0 : index
    %c0_28 = arith.constant 0 : index
    %74 = vector.load %arg4[%c0_27, %c0_28] : memref<16x1xf32, #tpu.memory_space<vmem>>, vector<16x1xf32>
    %75 = vector.broadcast %74 : vector<16x1xf32> to vector<16x256xf32>
    %76 = arith.mulf %73, %75 : vector<16x256xf32>
    %c0_29 = arith.constant 0 : index
    %c0_30 = arith.constant 0 : index
    %77 = vector.load %arg5[%c0_29, %c0_30] : memref<16x1xf32, #tpu.memory_space<vmem>>, vector<16x1xf32>
    %78 = vector.broadcast %77 : vector<16x1xf32> to vector<16x256xf32>
    %79 = arith.addf %76, %78 : vector<16x256xf32>
    %80 = arith.negf %79 : vector<16x256xf32>
    %81 = math.exp %80 : vector<16x256xf32>
    %cst_31 = arith.constant 1.000000e+00 : f32
    %82 = vector.broadcast %cst_31 : f32 to vector<16x256xf32>
    %83 = arith.addf %82, %81 : vector<16x256xf32>
    %84 = arith.divf %82, %83 : vector<16x256xf32>
    %85 = arith.mulf %79, %84 : vector<16x256xf32>
    %c17_i32 = arith.constant 17 : i32
    %86 = tpu.dynamic_rotate %85 by %c17_i32 dim 1 : vector<16x256xf32>, i32 -> vector<16x256xf32>
    %cst_32 = arith.constant 0.000000e+00 : f32
    %87 = vector.shape_cast %8 : vector<1x256xi1> to vector<1x256xi1>
    %88 = vector.broadcast %87 : vector<1x256xi1> to vector<16x256xi1>
    %89 = vector.broadcast %cst_32 : f32 to vector<16x256xf32>
    %90 = arith.select %88, %86, %89 : vector<16x256xi1>, vector<16x256xf32>
    %91 = arith.truncf %90 : vector<16x256xf32> to vector<16x256xbf16>
    %c16_i32 = arith.constant 16 : i32
    %92 = tpu.dynamic_rotate %85 by %c16_i32 dim 1 : vector<16x256xf32>, i32 -> vector<16x256xf32>
    %cst_33 = arith.constant 0.000000e+00 : f32
    %93 = vector.shape_cast %10 : vector<1x256xi1> to vector<1x256xi1>
    %94 = vector.broadcast %93 : vector<1x256xi1> to vector<16x256xi1>
    %95 = vector.broadcast %cst_33 : f32 to vector<16x256xf32>
    %96 = arith.select %94, %92, %95 : vector<16x256xi1>, vector<16x256xf32>
    %97 = arith.truncf %96 : vector<16x256xf32> to vector<16x256xbf16>
    %c15_i32_34 = arith.constant 15 : i32
    %98 = tpu.dynamic_rotate %85 by %c15_i32_34 dim 1 : vector<16x256xf32>, i32 -> vector<16x256xf32>
    %cst_35 = arith.constant 0.000000e+00 : f32
    %99 = vector.shape_cast %15 : vector<1x256xi1> to vector<1x256xi1>
    %100 = vector.broadcast %99 : vector<1x256xi1> to vector<16x256xi1>
    %101 = vector.broadcast %cst_35 : f32 to vector<16x256xf32>
    %102 = arith.select %100, %98, %101 : vector<16x256xi1>, vector<16x256xf32>
    %103 = arith.truncf %102 : vector<16x256xf32> to vector<16x256xbf16>
    %c1_i32_36 = arith.constant 1 : i32
    %104 = tpu.dynamic_rotate %85 by %c1_i32_36 dim 1 : vector<16x256xf32>, i32 -> vector<16x256xf32>
    %cst_37 = arith.constant 0.000000e+00 : f32
    %105 = vector.shape_cast %17 : vector<1x256xi1> to vector<1x256xi1>
    %106 = vector.broadcast %105 : vector<1x256xi1> to vector<16x256xi1>
    %107 = vector.broadcast %cst_37 : f32 to vector<16x256xf32>
    %108 = arith.select %106, %104, %107 : vector<16x256xi1>, vector<16x256xf32>
    %109 = arith.truncf %108 : vector<16x256xf32> to vector<16x256xbf16>
    %110 = arith.truncf %85 : vector<16x256xf32> to vector<16x256xbf16>
    %c255_i32 = arith.constant 255 : i32
    %111 = tpu.dynamic_rotate %85 by %c255_i32 dim 1 : vector<16x256xf32>, i32 -> vector<16x256xf32>
    %cst_38 = arith.constant 0.000000e+00 : f32
    %112 = vector.shape_cast %19 : vector<1x256xi1> to vector<1x256xi1>
    %113 = vector.broadcast %112 : vector<1x256xi1> to vector<16x256xi1>
    %114 = vector.broadcast %cst_38 : f32 to vector<16x256xf32>
    %115 = arith.select %113, %111, %114 : vector<16x256xi1>, vector<16x256xf32>
    %116 = arith.truncf %115 : vector<16x256xf32> to vector<16x256xbf16>
    %c241_i32 = arith.constant 241 : i32
    %117 = tpu.dynamic_rotate %85 by %c241_i32 dim 1 : vector<16x256xf32>, i32 -> vector<16x256xf32>
    %cst_39 = arith.constant 0.000000e+00 : f32
    %118 = vector.shape_cast %24 : vector<1x256xi1> to vector<1x256xi1>
    %119 = vector.broadcast %118 : vector<1x256xi1> to vector<16x256xi1>
    %120 = vector.broadcast %cst_39 : f32 to vector<16x256xf32>
    %121 = arith.select %119, %117, %120 : vector<16x256xi1>, vector<16x256xf32>
    %122 = arith.truncf %121 : vector<16x256xf32> to vector<16x256xbf16>
    %c240_i32 = arith.constant 240 : i32
    %123 = tpu.dynamic_rotate %85 by %c240_i32 dim 1 : vector<16x256xf32>, i32 -> vector<16x256xf32>
    %cst_40 = arith.constant 0.000000e+00 : f32
    %124 = vector.shape_cast %26 : vector<1x256xi1> to vector<1x256xi1>
    %125 = vector.broadcast %124 : vector<1x256xi1> to vector<16x256xi1>
    %126 = vector.broadcast %cst_40 : f32 to vector<16x256xf32>
    %127 = arith.select %125, %123, %126 : vector<16x256xi1>, vector<16x256xf32>
    %128 = arith.truncf %127 : vector<16x256xf32> to vector<16x256xbf16>
    %c239_i32 = arith.constant 239 : i32
    %129 = tpu.dynamic_rotate %85 by %c239_i32 dim 1 : vector<16x256xf32>, i32 -> vector<16x256xf32>
    %cst_41 = arith.constant 0.000000e+00 : f32
    %130 = vector.shape_cast %31 : vector<1x256xi1> to vector<1x256xi1>
    %131 = vector.broadcast %130 : vector<1x256xi1> to vector<16x256xi1>
    %132 = vector.broadcast %cst_41 : f32 to vector<16x256xf32>
    %133 = arith.select %131, %129, %132 : vector<16x256xi1>, vector<16x256xf32>
    %134 = arith.truncf %133 : vector<16x256xf32> to vector<16x256xbf16>
    %135 = tpu.concatenate %91, %97, %103, %109, %110, %116, %122, %128, %134 in 0 : vector<16x256xbf16>, vector<16x256xbf16>, vector<16x256xbf16>, vector<16x256xbf16>, vector<16x256xbf16>, vector<16x256xbf16>, vector<16x256xbf16>, vector<16x256xbf16>, vector<16x256xbf16> -> vector<144x256xbf16>
    %c0_42 = arith.constant 0 : index
    %c0_43 = arith.constant 0 : index
    %136 = vector.load %arg6[%c0_42, %c0_43] : memref<32x144xbf16, #tpu.memory_space<vmem>>, vector<32x144xbf16>
    %cst_44 = arith.constant dense<0.000000e+00> : vector<32x256xf32>
    %137 = tpu.matmul %136, %135, %cst_44 {dimension_numbers = #tpu.dot_dimension_numbers<[1], [0], [0], [1], [0, 0, 1, 1], [], []>} : vector<32x144xbf16>, vector<144x256xbf16>, vector<32x256xf32> -> vector<32x256xf32>
    %c0_45 = arith.constant 0 : index
    %c0_46 = arith.constant 0 : index
    %138 = vector.load %arg7[%c0_45, %c0_46] : memref<32x1xf32, #tpu.memory_space<vmem>>, vector<32x1xf32>
    %139 = vector.broadcast %138 : vector<32x1xf32> to vector<32x256xf32>
    %140 = arith.addf %137, %139 : vector<32x256xf32>
    %141 = tpu.iota {dimensions = array<i32: 0>} : vector<32x8xi32>
    %142 = tpu.iota {dimensions = array<i32: 1>} : vector<32x8xi32>
    %c4_i32 = arith.constant 4 : i32
    %143 = vector.broadcast %c4_i32 : i32 to vector<32x8xi32>
    %144 = arith.muli %142, %143 : vector<32x8xi32>
    %145 = arith.cmpi sge, %141, %144 : vector<32x8xi32>
    %c4_i32_47 = arith.constant 4 : i32
    %146 = vector.broadcast %c4_i32_47 : i32 to vector<32x8xi32>
    %147 = arith.addi %144, %146 : vector<32x8xi32>
    %148 = arith.cmpi slt, %141, %147 : vector<32x8xi32>
    %149 = arith.andi %145, %148 : vector<32x8xi1>
    %150 = arith.extui %149 : vector<32x8xi1> to vector<32x8xi32>
    %151 = arith.sitofp %150 : vector<32x8xi32> to vector<32x8xf32>
    %152 = tpu.iota {dimensions = array<i32: 1>} : vector<8x32xi32>
    %153 = tpu.iota {dimensions = array<i32: 0>} : vector<8x32xi32>
    %c4_i32_48 = arith.constant 4 : i32
    %154 = vector.broadcast %c4_i32_48 : i32 to vector<8x32xi32>
    %155 = arith.muli %153, %154 : vector<8x32xi32>
    %156 = arith.cmpi sge, %152, %155 : vector<8x32xi32>
    %c4_i32_49 = arith.constant 4 : i32
    %157 = vector.broadcast %c4_i32_49 : i32 to vector<8x32xi32>
    %158 = arith.addi %155, %157 : vector<8x32xi32>
    %159 = arith.cmpi slt, %152, %158 : vector<8x32xi32>
    %160 = arith.andi %156, %159 : vector<8x32xi1>
    %161 = arith.extui %160 : vector<8x32xi1> to vector<8x32xi32>
    %162 = arith.sitofp %161 : vector<8x32xi32> to vector<8x32xf32>
    %cst_50 = arith.constant dense<0.000000e+00> : vector<32xf32>
    %163 = vector.multi_reduction <add>, %140, %cst_50 [1] : vector<32x256xf32> to vector<32xf32>
    %164 = vector.shape_cast %163 : vector<32xf32> to vector<32x1xf32>
    %cst_51 = arith.constant dense<0.000000e+00> : vector<8x1xf32>
    %165 = tpu.matmul %162, %164, %cst_51 {dimension_numbers = #tpu.dot_dimension_numbers<[1], [0], [0], [1], [0, 0, 1, 1], [], []>} : vector<8x32xf32>, vector<32x1xf32>, vector<8x1xf32> -> vector<8x1xf32>
    %cst_52 = arith.constant dense<0.000000e+00> : vector<32x1xf32>
    %166 = tpu.matmul %151, %165, %cst_52 {dimension_numbers = #tpu.dot_dimension_numbers<[1], [0], [0], [1], [0, 0, 1, 1], [], []>} : vector<32x8xf32>, vector<8x1xf32>, vector<32x1xf32> -> vector<32x1xf32>
    %cst_53 = arith.constant 9.765625E-4 : f32
    %167 = vector.broadcast %cst_53 : f32 to vector<32x1xf32>
    %168 = arith.mulf %166, %167 : vector<32x1xf32>
    %169 = vector.broadcast %168 : vector<32x1xf32> to vector<32x256xf32>
    %170 = arith.subf %140, %169 : vector<32x256xf32>
    %171 = arith.mulf %170, %170 : vector<32x256xf32>
    %cst_54 = arith.constant dense<0.000000e+00> : vector<32xf32>
    %172 = vector.multi_reduction <add>, %171, %cst_54 [1] : vector<32x256xf32> to vector<32xf32>
    %173 = vector.shape_cast %172 : vector<32xf32> to vector<32x1xf32>
    %cst_55 = arith.constant dense<0.000000e+00> : vector<8x1xf32>
    %174 = tpu.matmul %162, %173, %cst_55 {dimension_numbers = #tpu.dot_dimension_numbers<[1], [0], [0], [1], [0, 0, 1, 1], [], []>} : vector<8x32xf32>, vector<32x1xf32>, vector<8x1xf32> -> vector<8x1xf32>
    %cst_56 = arith.constant dense<0.000000e+00> : vector<32x1xf32>
    %175 = tpu.matmul %151, %174, %cst_56 {dimension_numbers = #tpu.dot_dimension_numbers<[1], [0], [0], [1], [0, 0, 1, 1], [], []>} : vector<32x8xf32>, vector<8x1xf32>, vector<32x1xf32> -> vector<32x1xf32>
    %cst_57 = arith.constant 9.765625E-4 : f32
    %176 = vector.broadcast %cst_57 : f32 to vector<32x1xf32>
    %177 = arith.mulf %175, %176 : vector<32x1xf32>
    %cst_58 = arith.constant 9.99999974E-6 : f32
    %178 = vector.broadcast %cst_58 : f32 to vector<32x1xf32>
    %179 = arith.addf %177, %178 : vector<32x1xf32>
    %180 = math.rsqrt %179 : vector<32x1xf32>
    %181 = vector.broadcast %180 : vector<32x1xf32> to vector<32x256xf32>
    %182 = arith.mulf %170, %181 : vector<32x256xf32>
    %c0_59 = arith.constant 0 : index
    %c0_60 = arith.constant 0 : index
    %183 = vector.load %arg8[%c0_59, %c0_60] : memref<32x1xf32, #tpu.memory_space<vmem>>, vector<32x1xf32>
    %184 = vector.broadcast %183 : vector<32x1xf32> to vector<32x256xf32>
    %185 = arith.mulf %182, %184 : vector<32x256xf32>
    %c0_61 = arith.constant 0 : index
    %c0_62 = arith.constant 0 : index
    %186 = vector.load %arg9[%c0_61, %c0_62] : memref<32x1xf32, #tpu.memory_space<vmem>>, vector<32x1xf32>
    %187 = vector.broadcast %186 : vector<32x1xf32> to vector<32x256xf32>
    %188 = arith.addf %185, %187 : vector<32x256xf32>
    %189 = arith.negf %188 : vector<32x256xf32>
    %190 = math.exp %189 : vector<32x256xf32>
    %cst_63 = arith.constant 1.000000e+00 : f32
    %191 = vector.broadcast %cst_63 : f32 to vector<32x256xf32>
    %192 = arith.addf %191, %190 : vector<32x256xf32>
    %193 = arith.divf %191, %192 : vector<32x256xf32>
    %194 = arith.mulf %188, %193 : vector<32x256xf32>
    %c17_i32_64 = arith.constant 17 : i32
    %195 = tpu.dynamic_rotate %194 by %c17_i32_64 dim 1 : vector<32x256xf32>, i32 -> vector<32x256xf32>
    %cst_65 = arith.constant 0.000000e+00 : f32
    %196 = vector.shape_cast %8 : vector<1x256xi1> to vector<1x256xi1>
    %197 = vector.broadcast %196 : vector<1x256xi1> to vector<32x256xi1>
    %198 = vector.broadcast %cst_65 : f32 to vector<32x256xf32>
    %199 = arith.select %197, %195, %198 : vector<32x256xi1>, vector<32x256xf32>
    %200 = arith.truncf %199 : vector<32x256xf32> to vector<32x256xbf16>
    %c16_i32_66 = arith.constant 16 : i32
    %201 = tpu.dynamic_rotate %194 by %c16_i32_66 dim 1 : vector<32x256xf32>, i32 -> vector<32x256xf32>
    %cst_67 = arith.constant 0.000000e+00 : f32
    %202 = vector.shape_cast %10 : vector<1x256xi1> to vector<1x256xi1>
    %203 = vector.broadcast %202 : vector<1x256xi1> to vector<32x256xi1>
    %204 = vector.broadcast %cst_67 : f32 to vector<32x256xf32>
    %205 = arith.select %203, %201, %204 : vector<32x256xi1>, vector<32x256xf32>
    %206 = arith.truncf %205 : vector<32x256xf32> to vector<32x256xbf16>
    %c15_i32_68 = arith.constant 15 : i32
    %207 = tpu.dynamic_rotate %194 by %c15_i32_68 dim 1 : vector<32x256xf32>, i32 -> vector<32x256xf32>
    %cst_69 = arith.constant 0.000000e+00 : f32
    %208 = vector.shape_cast %15 : vector<1x256xi1> to vector<1x256xi1>
    %209 = vector.broadcast %208 : vector<1x256xi1> to vector<32x256xi1>
    %210 = vector.broadcast %cst_69 : f32 to vector<32x256xf32>
    %211 = arith.select %209, %207, %210 : vector<32x256xi1>, vector<32x256xf32>
    %212 = arith.truncf %211 : vector<32x256xf32> to vector<32x256xbf16>
    %c1_i32_70 = arith.constant 1 : i32
    %213 = tpu.dynamic_rotate %194 by %c1_i32_70 dim 1 : vector<32x256xf32>, i32 -> vector<32x256xf32>
    %cst_71 = arith.constant 0.000000e+00 : f32
    %214 = vector.shape_cast %17 : vector<1x256xi1> to vector<1x256xi1>
    %215 = vector.broadcast %214 : vector<1x256xi1> to vector<32x256xi1>
    %216 = vector.broadcast %cst_71 : f32 to vector<32x256xf32>
    %217 = arith.select %215, %213, %216 : vector<32x256xi1>, vector<32x256xf32>
    %218 = arith.truncf %217 : vector<32x256xf32> to vector<32x256xbf16>
    %219 = arith.truncf %194 : vector<32x256xf32> to vector<32x256xbf16>
    %c255_i32_72 = arith.constant 255 : i32
    %220 = tpu.dynamic_rotate %194 by %c255_i32_72 dim 1 : vector<32x256xf32>, i32 -> vector<32x256xf32>
    %cst_73 = arith.constant 0.000000e+00 : f32
    %221 = vector.shape_cast %19 : vector<1x256xi1> to vector<1x256xi1>
    %222 = vector.broadcast %221 : vector<1x256xi1> to vector<32x256xi1>
    %223 = vector.broadcast %cst_73 : f32 to vector<32x256xf32>
    %224 = arith.select %222, %220, %223 : vector<32x256xi1>, vector<32x256xf32>
    %225 = arith.truncf %224 : vector<32x256xf32> to vector<32x256xbf16>
    %c241_i32_74 = arith.constant 241 : i32
    %226 = tpu.dynamic_rotate %194 by %c241_i32_74 dim 1 : vector<32x256xf32>, i32 -> vector<32x256xf32>
    %cst_75 = arith.constant 0.000000e+00 : f32
    %227 = vector.shape_cast %24 : vector<1x256xi1> to vector<1x256xi1>
    %228 = vector.broadcast %227 : vector<1x256xi1> to vector<32x256xi1>
    %229 = vector.broadcast %cst_75 : f32 to vector<32x256xf32>
    %230 = arith.select %228, %226, %229 : vector<32x256xi1>, vector<32x256xf32>
    %231 = arith.truncf %230 : vector<32x256xf32> to vector<32x256xbf16>
    %c240_i32_76 = arith.constant 240 : i32
    %232 = tpu.dynamic_rotate %194 by %c240_i32_76 dim 1 : vector<32x256xf32>, i32 -> vector<32x256xf32>
    %cst_77 = arith.constant 0.000000e+00 : f32
    %233 = vector.shape_cast %26 : vector<1x256xi1> to vector<1x256xi1>
    %234 = vector.broadcast %233 : vector<1x256xi1> to vector<32x256xi1>
    %235 = vector.broadcast %cst_77 : f32 to vector<32x256xf32>
    %236 = arith.select %234, %232, %235 : vector<32x256xi1>, vector<32x256xf32>
    %237 = arith.truncf %236 : vector<32x256xf32> to vector<32x256xbf16>
    %c239_i32_78 = arith.constant 239 : i32
    %238 = tpu.dynamic_rotate %194 by %c239_i32_78 dim 1 : vector<32x256xf32>, i32 -> vector<32x256xf32>
    %cst_79 = arith.constant 0.000000e+00 : f32
    %239 = vector.shape_cast %31 : vector<1x256xi1> to vector<1x256xi1>
    %240 = vector.broadcast %239 : vector<1x256xi1> to vector<32x256xi1>
    %241 = vector.broadcast %cst_79 : f32 to vector<32x256xf32>
    %242 = arith.select %240, %238, %241 : vector<32x256xi1>, vector<32x256xf32>
    %243 = arith.truncf %242 : vector<32x256xf32> to vector<32x256xbf16>
    %244 = tpu.concatenate %200, %206, %212, %218, %219, %225, %231, %237, %243 in 0 : vector<32x256xbf16>, vector<32x256xbf16>, vector<32x256xbf16>, vector<32x256xbf16>, vector<32x256xbf16>, vector<32x256xbf16>, vector<32x256xbf16>, vector<32x256xbf16>, vector<32x256xbf16> -> vector<288x256xbf16>
    %c0_80 = arith.constant 0 : index
    %c0_81 = arith.constant 0 : index
    %245 = vector.load %arg10[%c0_80, %c0_81] : memref<32x288xbf16, #tpu.memory_space<vmem>>, vector<32x288xbf16>
    %cst_82 = arith.constant dense<0.000000e+00> : vector<32x256xf32>
    %246 = tpu.matmul %245, %244, %cst_82 {dimension_numbers = #tpu.dot_dimension_numbers<[1], [0], [0], [1], [0, 0, 1, 1], [], []>} : vector<32x288xbf16>, vector<288x256xbf16>, vector<32x256xf32> -> vector<32x256xf32>
    %c0_83 = arith.constant 0 : index
    %c0_84 = arith.constant 0 : index
    %247 = vector.load %arg11[%c0_83, %c0_84] : memref<32x1xf32, #tpu.memory_space<vmem>>, vector<32x1xf32>
    %248 = vector.broadcast %247 : vector<32x1xf32> to vector<32x256xf32>
    %249 = arith.addf %246, %248 : vector<32x256xf32>
    %c0_85 = arith.constant 0 : index
    %c0_86 = arith.constant 0 : index
    %250 = vector.load %arg12[%c0_85, %c0_86] : memref<32x16xbf16, #tpu.memory_space<vmem>>, vector<32x16xbf16>
    %251 = arith.truncf %1 : vector<16x256xf32> to vector<16x256xbf16>
    %cst_87 = arith.constant dense<0.000000e+00> : vector<32x256xf32>
    %252 = tpu.matmul %250, %251, %cst_87 {dimension_numbers = #tpu.dot_dimension_numbers<[1], [0], [0], [1], [0, 0, 1, 1], [], []>} : vector<32x16xbf16>, vector<16x256xbf16>, vector<32x256xf32> -> vector<32x256xf32>
    %c0_88 = arith.constant 0 : index
    %c0_89 = arith.constant 0 : index
    %253 = vector.load %arg13[%c0_88, %c0_89] : memref<32x1xf32, #tpu.memory_space<vmem>>, vector<32x1xf32>
    %254 = vector.broadcast %253 : vector<32x1xf32> to vector<32x256xf32>
    %255 = arith.addf %252, %254 : vector<32x256xf32>
    %256 = arith.addf %249, %255 : vector<32x256xf32>
    %cst_90 = arith.constant 1.000000e+00 : f32
    %257 = vector.broadcast %cst_90 : f32 to vector<32x256xf32>
    %258 = arith.mulf %256, %257 : vector<32x256xf32>
    %c0_91 = arith.constant 0 : index
    %c0_92 = arith.constant 0 : index
    %c0_93 = arith.constant 0 : index
    %259 = vector.load %arg14[%c0_91, %c0_92, %c0_93] : memref<1x32x256xf32, #tpu.memory_space<vmem>>, vector<1x32x256xf32>
    %260 = vector.shape_cast %259 : vector<1x32x256xf32> to vector<32x256xf32>
    %261 = vector.shape_cast %258 : vector<32x256xf32> to vector<1x32x256xf32>
    tpu.vector_store %arg14[%c0_91, %c0_92, %c0_93], %261 {strides = array<i32>} : memref<1x32x256xf32, #tpu.memory_space<vmem>>, vector<1x32x256xf32>,
    return
  }
  func.func @transform_0(%arg0: i32) -> (i32, i32, i32) {
    %c0_i32 = arith.constant 0 : i32
    %c0_i32_0 = arith.constant 0 : i32
    %c0_i32_1 = arith.constant 0 : i32
    return %arg0, %c0_i32, %c0_i32_0 : i32, i32, i32
  }
  func.func @transform_1(%arg0: i32) -> (i32, i32) {
    %c0_i32 = arith.constant 0 : i32
    %c0_i32_0 = arith.constant 0 : i32
    %c0_i32_1 = arith.constant 0 : i32
    return %c0_i32, %c0_i32_0 : i32, i32
  }
  func.func @transform_2(%arg0: i32) -> (i32, i32) {
    %c0_i32 = arith.constant 0 : i32
    %c0_i32_0 = arith.constant 0 : i32
    %c0_i32_1 = arith.constant 0 : i32
    return %c0_i32, %c0_i32_0 : i32, i32
  }
  func.func @transform_3(%arg0: i32) -> (i32, i32) {
    %c0_i32 = arith.constant 0 : i32
    %c0_i32_0 = arith.constant 0 : i32
    %c0_i32_1 = arith.constant 0 : i32
    return %c0_i32, %c0_i32_0 : i32, i32
  }
  func.func @transform_4(%arg0: i32) -> (i32, i32) {
    %c0_i32 = arith.constant 0 : i32
    %c0_i32_0 = arith.constant 0 : i32
    %c0_i32_1 = arith.constant 0 : i32
    return %c0_i32, %c0_i32_0 : i32, i32
  }
  func.func @transform_5(%arg0: i32) -> (i32, i32) {
    %c0_i32 = arith.constant 0 : i32
    %c0_i32_0 = arith.constant 0 : i32
    %c0_i32_1 = arith.constant 0 : i32
    return %c0_i32, %c0_i32_0 : i32, i32
  }
  func.func @transform_6(%arg0: i32) -> (i32, i32) {
    %c0_i32 = arith.constant 0 : i32
    %c0_i32_0 = arith.constant 0 : i32
    %c0_i32_1 = arith.constant 0 : i32
    return %c0_i32, %c0_i32_0 : i32, i32
  }
  func.func @transform_7(%arg0: i32) -> (i32, i32) {
    %c0_i32 = arith.constant 0 : i32
    %c0_i32_0 = arith.constant 0 : i32
    %c0_i32_1 = arith.constant 0 : i32
    return %c0_i32, %c0_i32_0 : i32, i32
  }
  func.func @transform_8(%arg0: i32) -> (i32, i32) {
    %c0_i32 = arith.constant 0 : i32
    %c0_i32_0 = arith.constant 0 : i32
    %c0_i32_1 = arith.constant 0 : i32
    return %c0_i32, %c0_i32_0 : i32, i32
  }
  func.func @transform_9(%arg0: i32) -> (i32, i32) {
    %c0_i32 = arith.constant 0 : i32
    %c0_i32_0 = arith.constant 0 : i32
    %c0_i32_1 = arith.constant 0 : i32
    return %c0_i32, %c0_i32_0 : i32, i32
  }
  func.func @transform_10(%arg0: i32) -> (i32, i32) {
    %c0_i32 = arith.constant 0 : i32
    %c0_i32_0 = arith.constant 0 : i32
    %c0_i32_1 = arith.constant 0 : i32
    return %c0_i32, %c0_i32_0 : i32, i32
  }
  func.func @transform_11(%arg0: i32) -> (i32, i32) {
    %c0_i32 = arith.constant 0 : i32
    %c0_i32_0 = arith.constant 0 : i32
    %c0_i32_1 = arith.constant 0 : i32
    return %c0_i32, %c0_i32_0 : i32, i32
  }
  func.func @transform_12(%arg0: i32) -> (i32, i32) {
    %c0_i32 = arith.constant 0 : i32
    %c0_i32_0 = arith.constant 0 : i32
    %c0_i32_1 = arith.constant 0 : i32
    return %c0_i32, %c0_i32_0 : i32, i32
  }
  func.func @transform_13(%arg0: i32) -> (i32, i32, i32) {
    %c0_i32 = arith.constant 0 : i32
    %c0_i32_0 = arith.constant 0 : i32
    %c0_i32_1 = arith.constant 0 : i32
    return %arg0, %c0_i32, %c0_i32_0 : i32, i32, i32
  }
}

</mosaic_0001>

<bundles_post_ra>
// kernel: tpu_custom_call.1
= control target key start
LH: loop header
LB: loop body
LE: loop exit
PB: predicated region body
PF: predicated region fallthrough
CT: control target
= control target key end

     0   :  { %s4375_s0 = inlined_call_operand.vmem [shape: f32[2,16,256], index: 0, kind: input, shape index: {}]   ;;  %s4376_s1 = inlined_call_operand.vmem [shape: s32[1,256], index: 1, kind: input, shape index: {}]   ;;  %s4377_s2 = inlined_call_operand.vmem [shape: s32[1,256], index: 2, kind: input, shape index: {}]   ;;  %s4378_s3 = inlined_call_operand.vmem [shape: f32[16,1], index: 3, kind: input, shape index: {}]   ;;  %s4379_s4 = inlined_call_operand.vmem [shape: f32[16,1], index: 4, kind: input, shape index: {}]   ;;  %s4380_s5 = inlined_call_operand.vmem [shape: bf16[32,144], index: 5, kind: input, shape index: {}]   ;;  %s4381_s6 = inlined_call_operand.vmem [shape: f32[32,1], index: 6, kind: input, shape index: {}]   ;;  %s4382_s7 = inlined_call_operand.vmem [shape: f32[32,1], index: 7, kind: input, shape index: {}]   ;;  %s4383_s8 = inlined_call_operand.vmem [shape: f32[32,1], index: 8, kind: input, shape index: {}]   ;;  %s4384_s9 = inlined_call_operand.vmem [shape: bf16[32,288], index: 9, kind: input, shape index: {}]   ;;  %s4385_s10 = inlined_call_operand.vmem [shape: f32[32,1], index: 10, kind: input, shape index: {}]   ;;  %s4386_s11 = inlined_call_operand.vmem [shape: bf16[32,16], index: 11, kind: input, shape index: {}]   ;;  %s4387_s12 = inlined_call_operand.vmem [shape: f32[32,1], index: 12, kind: input, shape index: {}]   ;;  %s4388_s13 = inlined_call_operand.hbm [shape: f32[2,32,256], index: 13, kind: output, shape index: {}]  }
   0x1   :  { %4445 = sst [smem:[#allocation5_spill]] %s4375_s0 }
   0x2   :  { %4446 = sst [smem:[#allocation6_spill]] %s4376_s1 }
   0x3   :  { %4447 = sst [smem:[#allocation7_spill]] %s4378_s3 }
   0x4   :  { %4448 = sst [smem:[#allocation8_spill]] %s4379_s4 }
   0x5   :  { %18 = vsyncpa [#allocation3], 0 }
   0x6   :  { %20 = vsyncpa [#allocation3 + $0x1], 0  ;;  %s3300_s25 = smov 0   ;;  %s3302_s26 = smov 0  }
   0x7   :  { %s3304_s27 = smov 0   ;;  %s3306_s28 = smov 0  }
   0x8 LB: > { %s3321_s29 = sadd.s32 4294967295, %s3215_s28   ;;  %s2476_s30 = sadd.s32 4294967294, %s3215_s28   ;;  %s3215_s28 = sphi %s3306_s28, %s4620_s28   ;;  %s3211_s27 = sphi %s3304_s27, %s4619_s27   ;;  %s3207_s26 = sphi %s3302_s26, %s4618_s26   ;;  %s3203_s25 = sphi %s3300_s25, %s4617_s25  }
   0x9   : > { %s3325_s14 = sadd.s32 1, %s3215_s28   ;;  %s311_s15 = sadd.s32 1, %s3211_s27 }
   0xa   : > { %s308_s16 = ssub.s32 %s3215_s28, %s3325_s14  ;;  %p321_p0 = scmp.ne.s32.totalorder %s3211_s27, %s3207_s26 }
   0xb   : > { %p309_p1 = scmp.eq.s32.totalorder %s308_s16, 0  ;;  %p322_p2 = scmp.eq.s32.totalorder %s3321_s29, 1 }
   0xc   : > { %p327_p3 = scmp.ne.s32.totalorder %s3207_s26, %s3203_s25  ;;  %p328_p4 = scmp.eq.s32.totalorder %s2476_s30, 1 }
   0xd   : > { %s3336_s17 = scalar_select %p309_p1, %s3211_s27, %s311_s15  }
   0xe   : > { %p3338_p5 = por %p322_p2, %p321_p0  ;;  %p3342_p6 = por %p328_p4, %p327_p3 }
   0xf   : > { %p2479_p7 = scmp.ge.s32.totalorder %s3215_s28, 1  ;;  %p390_p8 = scmp.lt.s32.totalorder %s3215_s28, 3 }
  0x11   : > { %p391_p9 = pnand %p2479_p7, %p390_p8 }
  0x12   : > { %p434_p10 = scmp.lt.s32.totalorder (!%p391_p9), %s3321_s29, 1  ;;  %s4451_s0 = sld [smem:[#allocation5_spill]] (!%p391_p9) }
  0x13   : > { %394 = sbr.rel (%p391_p9) target bundleno = 3603 (0xe13), region = 72  ;;  %s4452_s3 = sld [smem:[#allocation7_spill]] (!%p391_p9) }
  0x14   : > { %s4453_s4 = sld [smem:[#allocation8_spill]] (!%p391_p9)  ;;  %s4393_s15 = smov (!%p391_p9), 112  }
  0x15   : > { %s4391_s16 = smov (!%p391_p9), 113   ;;  %s4395_s22 = smov (!%p391_p9), 15  }
  0x16   : > { %s4399_s23 = smov (!%p391_p9), 16   ;;  %s4401_s30 = smov (!%p391_p9), 17  }
  0x17   : > { %s4454_s1 = sld [smem:[#allocation6_spill]] (!%p391_p9) }
  0x18   : > { %v3217_v0 = vmov 0.0   ;;  %s435_s20 = scalar_select %p434_p10, %s3321_s29, 1  ;;  %vm4409_vm0 = vmmov 0   ;;  %v454_v7 = vlaneseq  ;;  %vm4411_vm4 = vcmask 130048  }
  0x19   : > { %2720 = vmatprep.subr.mxu0 %v3217_v0  ;;  %2724 = vmatprep.mubr.msk.f32.mxu0 %vm4409_vm0, %v3217_v0  ;;  %vm4407_vm10 = vcmask 64512   ;;  %v3219_v22 = vmov 0   ;;  %v831_v43 = vld [vmem:[%s4452_s3] sm:$0xff]  ;;  %v832_v44 = vld [vmem:[%s4452_s3 + $0x8] sm:$0xff]  ;;  %s431_s3 = sand.u32 1, %s3207_s26  }
  0x1a   : > { %s2686_s21 = sshll.u32 %s435_s20, 5  ;;  %v3362_v8 = vshrl.u32 %v454_v7, 7  ;;  %v3365_v10 = vand.u32 127, %v454_v7  ;;  %2833 = vset.pattern.permute.xlu1 %v3219_v22  ;;  %2834 = vset.pattern.permute.xlu0 %v3219_v22  ;;  %v847_v53 = vld [vmem:[%s4453_s4] sm:$0xff]  ;;  %v848_v54 = vld [vmem:[%s4453_s4 + $0x8] sm:$0xff]  ;;  %s4389_s20 = smov 127  }
  0x1b   : > { %s3354_s24 = scalar_lea.vmem %s4451_s0, %s2686_s21  ;;  %s4397_s21 = smov 1  }
  0x1c   : > { %v442_v1 = vld [vmem:[%s3354_s24 + $0x10] sm:$0xff]  ;;  %v443_v2 = vld [vmem:[%s3354_s24 + $0x18] sm:$0xff]  ;;  %v440_v3 = vld [vmem:[%s3354_s24] sm:$0xff]  ;;  %v471_v9 = vmul.u32 2, %v3362_v8  ;;  %v459_v15 = vmul.u32 2, %v3365_v10  ;;  %v3374_v17 = vadd.s32 8, %v3362_v8 }
  0x1d   : > { %v481_v4 = vadd.f32 %v443_v2, %v442_v1  ;;  %v441_v5 = vld [vmem:[%s3354_s24 + $0x8] sm:$0xff]  ;;  %s4534_s0 = smov 127   ;;  %s2480_s4 = sshll.u32 %s431_s3, 6 }
  0x1e   : > { %v478_v6 = vadd.f32 %v441_v5, %v440_v3  ;;  %v473_v11 = vadd.s32 2, %v471_v9  ;;  %vm472_vm1 = vcmp.ge.s32.totalorder %v3365_v10, %v471_v9  ;;  %v462_v16 = vadd.s32 2, %v459_v15 }
  0x1f   : > { %482 = vadd.xlane.f32.xlu0 %v481_v4  ;;  %vm460_vm5 = vcmp.ge.s32.totalorder %v3362_v8, %v459_v15  ;;  %vm461_vm8 = vcmp.ge.s32.totalorder %v3374_v17, %v459_v15 }
  0x20   : > { %vm474_vm2 = vcmp.lt.s32.totalorder %v3365_v10, %v473_v11  ;;  %vm463_vm6 = vcmp.lt.s32.totalorder %v3362_v8, %v462_v16  ;;  %vm464_vm9 = vcmp.lt.s32.totalorder %v3374_v17, %v462_v16 }
  0x21   : > { %vm475_vm3 = vmand %vm472_vm1, %vm474_vm2  ;;  %vm4405_vm1 = vcmp.lt.s32.totalorder %v3365_v10, 112 }
  0x22   : > { %v2485_v13 = vsel %vm475_vm3, 1.0, %v3217_v0  ;;  %vm465_vm7 = vmand %vm460_vm5, %vm463_vm6  ;;  %vm4406_vm5 = vcmp.lt.s32.totalorder %v3365_v10, 113 }
  0x23   : > { %479 = vadd.xlane.f32.xlu0 %v478_v6  ;;  %v2483_v18 = vsel %vm465_vm7, 1.0, %v3217_v0  ;;  %vm466_vm11 = vmand %vm461_vm8, %vm464_vm9 }
  0x24   : > { %2729 = vmatprep.mubr.msk.f32.mxu1 %vm4407_vm10, %v2483_v18  ;;  %v2484_v20 = vsel %vm466_vm11, 1.0, %v3217_v0 }
  0xa8   : > { %v483_v12 = vpop.xlane.xlu0 %482 }
  0xa9   : > { %2721 = vmatpush3.msra.mxu0 %v483_v12 }
  0xaa   : > { %2722 = vmatprep.subr.mxu0 %v3217_v0 }
  0xac   : > { %v480_v14 = vpop.xlane.xlu0 %479 }
  0xad   : > { %2723 = vmatpush3.msra.mxu0 %v480_v14 }
  0xae   : > { %2725 = vmatmul.mubr.msk.f32.vlgmr.msra.gmra.mxu0 %vm4411_vm4, %v2485_v13 }
 0x16e   : > { %v554_v19 = vpop.f32.mrf.mxu0 }
 0x16f   : > { %2727 = vmatprep.subr.mxu1 %v554_v19 }
 0x170   : > { %v2726_v21 = vpop.f32.mrf.mxu0  ;;  %2728 = vmatpush3.msra.mxu1 %v554_v19 }
 0x171   : > { %2730 = vmatmul.mubr.msk.f32.vlgmr.msra.gmra.mxu1 %vm4407_vm10, %v2484_v20  ;;  %2732 = vmatprep.subr.mxu1 %v3217_v0 }
 0x172   : > { %2736 = vmatprep.mubr.msk.f32.mxu1 %vm4409_vm0, %v3217_v0 }
 0x231   : > { %v2731_v23 = vpop.f32.mrf.mxu1 }
 0x232   : > { %v641_v24 = vmul.f32 0.001953125, %v2731_v23 }
 0x233   : > { %v631_v25 = vpop.f32.mrf.mxu1 }
 0x234   : > { %649 = vperm.xlu1 %2833, %v641_v24   ;;  %v640_v26 = vmul.f32 0.001953125, %v631_v25 }
 0x238   : > { %644 = vperm.xlu1 %2833, %v640_v26  }
 0x2af   : > { %v650_v27 = vpop.permute.xlu1 %649 }
 0x2b0   : > { %v654_v28 = vsub.f32 %v442_v1, %v650_v27  ;;  %v655_v29 = vsub.f32 %v443_v2, %v650_v27 }
 0x2b2   : > { %v658_v30 = vmul.f32 %v654_v28, %v654_v28  ;;  %v659_v31 = vmul.f32 %v655_v29, %v655_v29 }
 0x2b3   : > { %v645_v32 = vpop.permute.xlu1 %644 }
 0x2b4   : > { %v652_v33 = vsub.f32 %v440_v3, %v645_v32  ;;  %v653_v34 = vsub.f32 %v441_v5, %v645_v32  ;;  %v663_v35 = vadd.f32 %v659_v31, %v658_v30 }
 0x2b6   : > { %664 = vadd.xlane.f32.xlu0 %v663_v35  ;;  %v656_v36 = vmul.f32 %v652_v33, %v652_v33  ;;  %v657_v37 = vmul.f32 %v653_v34, %v653_v34 }
 0x2b8   : > { %v660_v38 = vadd.f32 %v657_v37, %v656_v36 }
 0x2ba   : > { %661 = vadd.xlane.f32.xlu1 %v660_v38  ;;  %v3075_v38 = vld [vmem:[%s4380_s5 + $0x4] ss:$8 sps:$4 sm:$0xff]  }
 0x2cc   : > { %835 = vperm.xlu0 %2834, %v831_v43   ;;  %v3456_v43 = vld [vmem:[%s4377_s2] sm:$0x3] }
 0x2cd   : > { %vm447_vm12 = vcmp.ge.s32.totalorder %v3456_v43, 1  ;;  %vm449_vm15 = vcmp.lt.s32.totalorder %v3456_v43, 15 }
 0x2d0   : > { %840 = vperm.xlu0 %2834, %v832_v44   ;;  %v3461_v44 = vld [vmem:[%s4454_s1] sm:$0x3] }
 0x2d1   : > { %vm451_vm13 = vcmp.lt.s32.totalorder %v3461_v44, 15  ;;  %vm446_vm7 = vcmp.ge.s32.totalorder %v3461_v44, 1 }
 0x2d2   : > { %vm452_vm14 = vmand %vm451_vm13, %vm447_vm12 }
 0x33f   : > { %v665_v39 = vpop.xlane.xlu0 %664 }
 0x340   : > { %2733 = vmatpush3.msra.mxu1 %v665_v39  ;;  %v1140_v39 = vld [vmem:[%s4381_s6 + $0x18] sm:$0xff] }
 0x341   : > { %2734 = vmatprep.subr.mxu1 %v3217_v0 }
 0x343   : > { %v662_v40 = vpop.xlane.xlu1 %661 }
 0x344   : > { %2735 = vmatpush3.msra.mxu1 %v662_v40  ;;  %v1139_v40 = vld [vmem:[%s4381_s6 + $0x10] sm:$0xff] }
 0x345   : > { %2737 = vmatmul.mubr.msk.f32.vlgmr.msra.gmra.mxu1 %vm4411_vm4, %v2485_v13 }
 0x346   : > { %2741 = vmatprep.mubr.msk.f32.mxu1 %vm4407_vm10, %v2483_v18 }
 0x347   : > { %v836_v55 = vpop.permute.xlu0 %835 }
 0x34b   : > { %v841_v56 = vpop.permute.xlu0 %840 }
 0x405   : > { %v732_v41 = vpop.f32.mrf.mxu1 }
 0x406   : > { %2739 = vmatprep.subr.mxu1 %v732_v41 }
 0x407   : > { %v2738_v42 = vpop.f32.mrf.mxu1  ;;  %2740 = vmatpush3.msra.mxu1 %v732_v41  ;;  %v1138_v41 = vld [vmem:[%s4381_s6 + $0x8] sm:$0xff] }
 0x408   : > { %2742 = vmatmul.mubr.msk.f32.vlgmr.msra.gmra.mxu1 %vm4407_vm10, %v2484_v20  ;;  %v1137_v42 = vld [vmem:[%s4381_s6] sm:$0xff]  ;;  %vm4412_vm10 = vcmp.lt.s32.totalorder %v3365_v10, 1 }
 0x409   : > { %2548 = vmatprep.mubr.msk.bf16.mxu1 %vm4411_vm4, %v3075_v38 }
 0x4c8   : > { %v2743_v45 = vpop.f32.mrf.mxu1 }
 0x4c9   : > { %v812_v46 = vmul.f32 0.001953125, %v2743_v45  ;;  %v3466_v45 = vsub.s32 1, %v3362_v8 }
 0x4ca   : > { %v802_v47 = vpop.f32.mrf.mxu1 }
 0x4cb   : > { %v814_v48 = vadd.f32 1e-05, %v812_v46  ;;  %v811_v49 = vmul.f32 0.001953125, %v802_v47  ;;  %v3473_v46 = vsub.s32 0, %v3362_v8  ;;  %v1086_v47 = vsel %vm451_vm13, 1, %v3219_v22 }
 0x4cd   : > { %3091 = vrsqrt.f32 %v814_v48  ;;  %v813_v50 = vadd.f32 1e-05, %v811_v49  ;;  %v1056_v48 = vsel %vm452_vm14, 1, %v3219_v22  ;;  %v1094_v49 = vrot.slane %v1086_v47, %v3466_v45 }
 0x4ce   : > { %vm4408_vm14 = vcmp.lt.s32.totalorder %v3365_v10, 127 }
 0x4cf   : > { %3093 = vrsqrt.f32 %v813_v50  ;;  %v1090_v50 = vrot.slane %v1086_v47, %v3473_v46  ;;  %vm1096_vm2 = vcmp.eq.s32.totalorder %v1094_v49, 1 }
 0x4d0   : > { %vm3507_vm8 = vmpackc.low %vm1096_vm2, %vm1096_vm2 }
 0x4d1   : > { %vm3487_vm3 = vcmp.eq.s32.totalorder %v1090_v50, 1 }
 0x4d2   : > { %vm3514_vm9 = vmpackc.low %vm3487_vm3, %vm3487_vm3 }
 0x4da   : > { %v3092_v51 = vpop.eup %3091 }
 0x4db   : > { %824 = vperm.xlu1 %2833, %v3092_v51   ;;  %v1064_v51 = vrot.slane %v1056_v48, %v3466_v45 }
 0x4dc   : > { %v3094_v52 = vpop.eup %3093 }
 0x4dd   : > { %819 = vperm.xlu0 %2834, %v3094_v52   ;;  %vm3493_vm6 = vcmp.eq.s32.totalorder %v1064_v51, 1 }
 0x4de   : > { %vm3529_vm2 = vmpackc.low %vm3493_vm6, %vm3493_vm6 }
 0x4df   : > { %851 = vperm.xlu1 %2833, %v847_v53   ;;  %v1026_v53 = vsel %vm449_vm15, 1, %v3219_v22  ;;  %vm450_vm6 = vmand %vm446_vm7, %vm449_vm15 }
 0x4e0   : > { %v964_v49 = vsel %vm450_vm6, 1, %v3219_v22 }
 0x4e1   : > { %856 = vperm.xlu0 %2834, %v848_v54  }
 0x556   : > { %v825_v57 = vpop.permute.xlu1 %824 }
 0x557   : > { %v829_v58 = vmul.f32 %v825_v57, %v654_v28  ;;  %v830_v59 = vmul.f32 %v825_v57, %v655_v29 }
 0x558   : > { %v820_v60 = vpop.permute.xlu0 %819 }
 0x559   : > { %v827_v61 = vmul.f32 %v820_v60, %v652_v33  ;;  %v828_v62 = vmul.f32 %v820_v60, %v653_v34  ;;  %v845_v2 = vmul.f32 %v841_v56, %v829_v58  ;;  %v846_v3 = vmul.f32 %v841_v56, %v830_v59 }
 0x55a   : > { %v852_v4 = vpop.permute.xlu1 %851  ;;  %v1060_v60 = vrot.slane %v1056_v48, %v3473_v46 }
 0x55b   : > { %v843_v63 = vmul.f32 %v836_v55, %v827_v61  ;;  %v844_v1 = vmul.f32 %v836_v55, %v828_v62  ;;  %v1034_v62 = vrot.slane %v1026_v53, %v3466_v45  ;;  %v4475_v61 = vmov 0 }
 0x55c   : > { %v857_v5 = vpop.permute.xlu0 %856  ;;  %vm3518_vm11 = vcmp.eq.s32.totalorder %v1060_v60, 1 }
 0x55d   : > { %v859_v6 = vadd.f32 %v852_v4, %v843_v63  ;;  %v860_v7 = vadd.f32 %v852_v4, %v844_v1  ;;  %v861_v9 = vadd.f32 %v857_v5, %v845_v2  ;;  %v862_v11 = vadd.f32 %v857_v5, %v846_v3 }
 0x55e   : > { %v4459_v5 = vmov 0  ;;  %vm3533_vm3 = vcmp.eq.s32.totalorder %v1034_v62, 1 }
 0x55f   : > { %v2492_v12 = vmul.f32 -1.442695, %v859_v6  ;;  %v2493_v13 = vmul.f32 -1.442695, %v860_v7  ;;  %v2494_v14 = vmul.f32 -1.442695, %v861_v9 }
 0x560   : > { %v2495_v15 = vmul.f32 -1.442695, %v862_v11  ;;  %v4460_v5 = vsel %vm3507_vm8, 4294967295, %v4459_v5 }
 0x561   : > { %3095 = vpow2.f32 %v2492_v12 }
 0x562   : > { %3097 = vpow2.f32 %v2493_v13  ;;  %v4461_v13 = vmov 0 }
 0x563   : > { %3099 = vpow2.f32 %v2494_v14  ;;  %v4462_v13 = vsel %vm3514_vm9, 4294967295, %v4461_v13 }
 0x564   : > { %3101 = vpow2.f32 %v2495_v15 }
 0x56e   : > { %v3096_v16 = vpop.eup %3095 }
 0x56f   : > { %v3098_v18 = vpop.eup %3097  ;;  %v875_v19 = vadd.f32 1.0, %v3096_v16 }
 0x570   : > { %v3100_v20 = vpop.eup %3099  ;;  %v876_v21 = vadd.f32 1.0, %v3098_v18  ;;  %v1030_v18 = vrot.slane %v1026_v53, %v3473_v46 }
 0x571   : > { %v3102_v23 = vpop.eup %3101  ;;  %3103 = vrcp.f32 %v875_v19  ;;  %v877_v24 = vadd.f32 1.0, %v3100_v20  ;;  %v4465_v19 = vmov 0 }
 0x572   : > { %3105 = vrcp.f32 %v876_v21  ;;  %v878_v25 = vadd.f32 1.0, %v3102_v23  ;;  %v4466_v19 = vsel %vm3529_vm2, 4294967295, %v4465_v19  ;;  %v994_v21 = vsel %vm447_vm12, 1, %v3219_v22 }
 0x573   : > { %3107 = vrcp.f32 %v877_v24  ;;  %v998_v47 = vrot.slane %v994_v21, %v3473_v46  ;;  %v1002_v48 = vrot.slane %v994_v21, %v3466_v45 }
 0x574   : > { %3109 = vrcp.f32 %v878_v25 }
 0x575   : > { %vm3619_vm0 = vcmp.eq.s32.totalorder %v998_v47, 1 }
 0x57e   : > { %v3104_v26 = vpop.eup %3103 }
 0x57f   : > { %v3106_v27 = vpop.eup %3105  ;;  %v3405_v28 = vmul.f32 %v3104_v26, %v859_v6 }
 0x580   : > { %v3108_v29 = vpop.eup %3107  ;;  %v3407_v30 = vmul.f32 %v3106_v27, %v860_v7 }
 0x581   : > { %v3110_v31 = vpop.eup %3109  ;;  %v3409_v32 = vmul.f32 %v3108_v29, %v861_v9 }
 0x582   : > { %v3411_v33 = vmul.f32 %v3110_v31, %v862_v11 }
 0x583   : > { %v2835_v34 = vpack.i.bf16 %v3409_v32, %v3405_v28  ;;  %v1011_v37 = vpack.c.bf16 %v3409_v32, %v3405_v28 }
 0x584   : > { %v2840_v35 = vpack.i.bf16 %v3411_v33, %v3407_v30  ;;  %v1012_v36 = vpack.c.bf16 %v3411_v33, %v3407_v30 }
 0x585   : > { %2836 = vrot.lane.b32.xlu1 %v2835_v34, %s4393_s15 }
 0x586   : > { %2841 = vrot.lane.b32.xlu0 %v2840_v35, %s4393_s15  ;;  %s4403_s15 = smov 111  }
 0x589   : > { %2846 = vrot.lane.b32.xlu1 %v2835_v34, %s4391_s16 }
 0x58a   : > { %2851 = vrot.lane.b32.xlu0 %v2840_v35, %s4391_s16  ;;  %s4531_s16 = smov 112  }
 0x58d   : > { %2856 = vrot.lane.b32.xlu1 %v2835_v34, %s4389_s20 }
 0x58e   : > { %2861 = vrot.lane.b32.xlu0 %v2840_v35, %s4389_s20  ;;  %s4532_s20 = smov 113  }
 0x591   : > { %2866 = vrot.lane.b32.xlu1 %v2835_v34, %s4397_s21 }
 0x592   : > { %2871 = vrot.lane.b32.xlu0 %v2840_v35, %s4397_s21  ;;  %s4533_s21 = smov 111  }
 0x595   : > { %2876 = vrot.lane.b32.xlu1 %v2835_v34, %s4395_s22 }
 0x596   : > { %2881 = vrot.lane.b32.xlu0 %v2840_v35, %s4395_s22  ;;  %s4528_s22 = smov 15  }
 0x599   : > { %2886 = vrot.lane.b32.xlu1 %v2835_v34, %s4399_s23 }
 0x59a   : > { %2891 = vrot.lane.b32.xlu0 %v2840_v35, %s4399_s23  ;;  %s4529_s23 = smov 16  }
 0x59d   : > { %2896 = vrot.lane.b32.xlu1 %v2835_v34, %s4401_s30 }
 0x59e   : > { %2901 = vrot.lane.b32.xlu0 %v2840_v35, %s4401_s30  ;;  %s4530_s30 = smov 17  }
 0x5a1   : > { %2906 = vrot.lane.b32.xlu1 %v2835_v34, %s4403_s15 }
 0x5a2   : > { %2911 = vrot.lane.b32.xlu0 %v2840_v35, %s4403_s15  ;;  %s4527_s15 = smov 1  }
 0x5a5   : > { %1158 = vperm.xlu1 %2833, %v1140_v39   ;;  %v4469_v39 = vmov 0 }
 0x5a6   : > { %1153 = vperm.xlu0 %2834, %v1139_v40  }
 0x5a9   : > { %1148 = vperm.xlu1 %2833, %v1138_v41  }
 0x5aa   : > { %1143 = vperm.xlu0 %2834, %v1137_v42  }
 0x5f7   : > { %v2837_v52 = vpop.permute.xlu1 %2836 }
 0x5f8   : > { %v2842_v54 = vpop.permute.xlu0 %2841  ;;  %v2839_v55 = vunpack.i.h.bf16 %v2837_v52  ;;  %v2838_v56 = vunpack.i.l.bf16 %v2837_v52 }
 0x5f9   : > { %v2844_v57 = vunpack.i.h.bf16 %v2842_v54  ;;  %v2843_v58 = vunpack.i.l.bf16 %v2842_v54 }
 0x5fb   : > { %v1083_v63 = vsel %vm4405_vm1, %v2839_v55, %v2844_v57  ;;  %v1085_v1 = vsel %vm4405_vm1, %v2844_v57, %v2839_v55  ;;  %v1082_v2 = vsel %vm4405_vm1, %v2838_v56, %v2843_v58  ;;  %v1084_v3 = vsel %vm4405_vm1, %v2843_v58, %v2838_v56  ;;  %v2847_v4 = vpop.permute.xlu1 %2846  ;;  %vm3557_vm1 = vmpackc.low %vm3518_vm11, %vm3518_vm11 }
 0x5fc   : > { %v2501_v6 = vpack.c.bf16 %v1085_v1, %v1084_v3  ;;  %v2504_v7 = vpack.c.bf16 %v1083_v63, %v1082_v2  ;;  %v2852_v9 = vpop.permute.xlu0 %2851  ;;  %v2849_v11 = vunpack.i.h.bf16 %v2847_v4  ;;  %v2848_v12 = vunpack.i.l.bf16 %v2847_v4  ;;  %vm3584_vm11 = vmpackc.low %vm3533_vm3, %vm3533_vm3 }
 0x5fd   : > { %v2854_v14 = vunpack.i.h.bf16 %v2852_v9  ;;  %v2853_v15 = vunpack.i.l.bf16 %v2852_v9  ;;  %v4470_v39 = vsel %vm3557_vm1, 4294967295, %v4469_v39  ;;  %v4473_v55 = vmov 0 }
 0x5fe   : > { %2502 = vmatprep.subr.msk.bf16.mxu1 %vm3507_vm8, %v2501_v6  ;;  %v4474_v55 = vsel %vm3584_vm11, 4294967295, %v4473_v55  ;;  %v972_v1 = vrot.slane %v964_v49, %v3466_v45  ;;  %vm3598_vm3 = vcmp.eq.s32.totalorder %v1002_v48, 1  ;;  %v934_v3 = vsel %vm446_vm7, 1, %v3219_v22 }
 0x5ff   : > { %v1053_v23 = vsel %vm4406_vm5, %v2849_v11, %v2854_v14  ;;  %v1055_v24 = vsel %vm4406_vm5, %v2854_v14, %v2849_v11  ;;  %v1052_v25 = vsel %vm4406_vm5, %v2848_v12, %v2853_v15  ;;  %v1054_v26 = vsel %vm4406_vm5, %v2853_v15, %v2848_v12  ;;  %2505 = vmatpush1.bf16.msk.msra.mxu1 %vm3514_vm9, %v2504_v7  ;;  %v2857_v27 = vpop.permute.xlu1 %2856  ;;  %vm3627_vm4 = vmpackc.low %vm3598_vm3, %vm3598_vm3 }
 0x600   : > { %v2507_v29 = vpack.c.bf16 %v1055_v24, %v1054_v26  ;;  %v2510_v31 = vpack.c.bf16 %v1053_v23, %v1052_v25  ;;  %v2862_v34 = vpop.permute.xlu0 %2861  ;;  %v2859_v35 = vunpack.i.h.bf16 %v2857_v27  ;;  %v2858_v38 = vunpack.i.l.bf16 %v2857_v27  ;;  %vm3652_vm3 = vmpackc.low %vm3619_vm0, %vm3619_vm0 }
 0x601   : > { %v2864_v40 = vunpack.i.h.bf16 %v2862_v34  ;;  %v2863_v41 = vunpack.i.l.bf16 %v2862_v34  ;;  %vm3561_vm5 = vcmp.eq.s32.totalorder %v1030_v18, 1  ;;  %v968_v15 = vrot.slane %v964_v49, %v3473_v46  ;;  %vm453_vm0 = vmand %vm451_vm13, %vm449_vm15 }
 0x602   : > { %2508 = vmatprep.subr.msk.bf16.mxu1 %vm3529_vm2, %v2507_v29  ;;  %vm3591_vm6 = vmpackc.low %vm3561_vm5, %vm3561_vm5  ;;  %vm4413_vm5 = vcmp.lt.s32.totalorder %v3365_v10, 15  ;;  %v942_v30 = vrot.slane %v934_v3, %v3466_v45  ;;  %v938_v28 = vrot.slane %v934_v3, %v3473_v46  ;;  %vm4415_vm15 = vcmp.lt.s32.totalorder %v3365_v10, 17 }
 0x603   : > { %v1023_v50 = vsel %vm4408_vm14, %v2859_v35, %v2864_v40  ;;  %v1025_v51 = vsel %vm4408_vm14, %v2864_v40, %v2859_v35  ;;  %v1022_v52 = vsel %vm4408_vm14, %v2858_v38, %v2863_v41  ;;  %v1024_v53 = vsel %vm4408_vm14, %v2863_v41, %v2858_v38  ;;  %2511 = vmatpush1.bf16.msk.msra.mxu1 %vm3557_vm1, %v2510_v31  ;;  %v2867_v54 = vpop.permute.xlu1 %2866  ;;  %vm448_vm14 = vmand %vm446_vm7, %vm447_vm12 }
 0x604   : > { %v2513_v56 = vpack.c.bf16 %v1025_v51, %v1024_v53  ;;  %v2516_v57 = vpack.c.bf16 %v1023_v50, %v1022_v52  ;;  %v2872_v58 = vpop.permute.xlu0 %2871  ;;  %v2869_v59 = vunpack.i.h.bf16 %v2867_v54  ;;  %v2868_v60 = vunpack.i.l.bf16 %v2867_v54 }
 0x605   : > { %v4476_v61 = vsel %vm3591_vm6, 4294967295, %v4475_v61  ;;  %v2874_v62 = vunpack.i.h.bf16 %v2872_v58  ;;  %v2873_v63 = vunpack.i.l.bf16 %v2872_v58  ;;  %vm3631_vm12 = vcmp.eq.s32.totalorder %v972_v1, 1 }
 0x606   : > { %2514 = vmatprep.subr.msk.bf16.mxu1 %vm3584_vm11, %v2513_v56  ;;  %v904_v24 = vsel %vm448_vm14, 1, %v3219_v22  ;;  %vm4414_vm7 = vcmp.lt.s32.totalorder %v3365_v10, 16  ;;  %vm3658_vm14 = vcmp.eq.s32.totalorder %v968_v15, 1  ;;  %v4489_v41 = vmov 0 }
 0x607   : > { %v991_v4 = vsel %vm4412_vm10, %v2869_v59, %v2874_v62  ;;  %v990_v6 = vsel %vm4412_vm10, %v2868_v60, %v2873_v63  ;;  %2517 = vmatpush1.bf16.msk.msra.mxu1 %vm3591_vm6, %v2516_v57  ;;  %v2877_v7 = vpop.permute.xlu1 %2876  ;;  %v993_v33 = vsel %vm4412_vm10, %v2874_v62, %v2869_v59  ;;  %v912_v42 = vrot.slane %v904_v24, %v3466_v45 }
 0x608   : > { %v2882_v9 = vpop.permute.xlu0 %2881  ;;  %v2879_v11 = vunpack.i.h.bf16 %v2877_v7  ;;  %v2878_v12 = vunpack.i.l.bf16 %v2877_v7  ;;  %1191 = vmatprep.subr.bf16.mxu1 %v1012_v36  ;;  %v992_v36 = vsel %vm4412_vm10, %v2873_v63, %v2868_v60  ;;  %v2519_v23 = vpack.c.bf16 %v991_v4, %v990_v6  ;;  %vm3670_vm10 = vmpackc.low %vm3631_vm12, %vm3631_vm12 }
 0x609   : > { %v2884_v16 = vunpack.i.h.bf16 %v2882_v9  ;;  %v2883_v18 = vunpack.i.l.bf16 %v2882_v9  ;;  %v2522_v32 = vpack.c.bf16 %v993_v33, %v992_v36  ;;  %v4490_v41 = vsel %vm3670_vm10, 4294967295, %v4489_v41  ;;  %vm3696_vm12 = vmpackc.low %vm3658_vm14, %vm3658_vm14 }
 0x60a   : > { %vm3679_vm13 = vcmp.eq.s32.totalorder %v942_v30, 1  ;;  %v1116_v52 = vsel %vm453_vm0, 1, %v3219_v22  ;;  %v4493_v57 = vmov 0  ;;  %v908_v59 = vrot.slane %v904_v24, %v3473_v46 }
 0x60b   : > { %v961_v25 = vsel %vm4413_vm5, %v2879_v11, %v2884_v16  ;;  %v960_v26 = vsel %vm4413_vm5, %v2878_v12, %v2883_v18  ;;  %1192 = vmatpush1.bf16.msra.mxu1 %v1011_v37  ;;  %v2887_v27 = vpop.permute.xlu1 %2886  ;;  %v963_v47 = vsel %vm4413_vm5, %v2884_v16, %v2879_v11  ;;  %v962_v43 = vsel %vm4413_vm5, %v2883_v18, %v2878_v12  ;;  %vm3708_vm0 = vmpackc.low %vm3679_vm13, %vm3679_vm13 }
 0x60c   : > { %v2892_v31 = vpop.permute.xlu0 %2891  ;;  %v2889_v34 = vunpack.i.h.bf16 %v2887_v27  ;;  %v2888_v35 = vunpack.i.l.bf16 %v2887_v27  ;;  %2520 = vmatprep.subr.msk.bf16.mxu1 %vm3627_vm4, %v2519_v23  ;;  %v2525_v44 = vpack.c.bf16 %v961_v25, %v960_v26  ;;  %v4494_v57 = vsel %vm3696_vm12, 4294967295, %v4493_v57 }
 0x60d   : > { %v2894_v37 = vunpack.i.h.bf16 %v2892_v31  ;;  %v2893_v40 = vunpack.i.l.bf16 %v2892_v31  ;;  %vm3700_vm5 = vcmp.eq.s32.totalorder %v938_v28, 1  ;;  %v2528_v60 = vpack.c.bf16 %v963_v47, %v962_v43  ;;  %v3080_v47 = vld [vmem:[%s4380_s5 + $0x10] ss:$8 sps:$4 sm:$0xff]  }
 0x60e   : > { %v4497_v1 = vmov 0  ;;  %vm3712_vm14 = vcmp.eq.s32.totalorder %v912_v42, 1  ;;  %v1124_v7 = vrot.slane %v1116_v52, %v3466_v45  ;;  %v4501_v45 = vmov 0  ;;  %v3078_v42 = vld [vmem:[%s4380_s5 + $0x14] ss:$8 sps:$4 sm:$0xff]  }
 0x60f   : > { %v931_v49 = vsel %vm4414_vm7, %v2889_v34, %v2894_v37  ;;  %v930_v50 = vsel %vm4414_vm7, %v2888_v35, %v2893_v40  ;;  %2523 = vmatpush1.bf16.msk.msra.mxu1 %vm3652_vm3, %v2522_v32  ;;  %v2897_v51 = vpop.permute.xlu1 %2896  ;;  %v4498_v1 = vsel %vm3708_vm0, 4294967295, %v4497_v1  ;;  %v933_v3 = vsel %vm4414_vm7, %v2894_v37, %v2889_v34  ;;  %vm3740_vm13 = vmpackc.low %vm3712_vm14, %vm3712_vm14 }
 0x610   : > { %v2902_v53 = vpop.permute.xlu0 %2901  ;;  %v2899_v54 = vunpack.i.h.bf16 %v2897_v51  ;;  %v2898_v56 = vunpack.i.l.bf16 %v2897_v51  ;;  %2526 = vmatprep.subr.msk.bf16.mxu1 %vm3670_vm10, %v2525_v44  ;;  %v932_v4 = vsel %vm4414_vm7, %v2893_v40, %v2888_v35  ;;  %v2531_v6 = vpack.c.bf16 %v931_v49, %v930_v50  ;;  %vm3733_vm7 = vmpackc.low %vm3700_vm5, %vm3700_vm5  ;;  %v3077_v40 = vld [vmem:[%s4380_s5] ss:$8 sps:$4 sm:$0xff]  }
 0x611   : > { %v2904_v62 = vunpack.i.h.bf16 %v2902_v53  ;;  %v2903_v63 = vunpack.i.l.bf16 %v2902_v53  ;;  %v4502_v45 = vsel %vm3733_vm7, 4294967295, %v4501_v45  ;;  %v2534_v18 = vpack.c.bf16 %v933_v3, %v932_v4 }
 0x612   : > { %v4503_v33 = vmov 0  ;;  %v1120_v36 = vrot.slane %v1116_v52, %v3473_v46  ;;  %vm4505_vm6 = vcmp.lt.s32.totalorder %v3365_v10, 17  ;;  %vm1126_vm11 = vcmp.eq.s32.totalorder %v1124_v7, 1 }
 0x613   : > { %v901_v9 = vsel %vm4415_vm15, %v2899_v54, %v2904_v62  ;;  %v900_v11 = vsel %vm4415_vm15, %v2898_v56, %v2903_v63  ;;  %2529 = vmatpush1.bf16.msk.msra.mxu1 %vm3696_vm12, %v2528_v60  ;;  %v2907_v12 = vpop.permute.xlu1 %2906  ;;  %vm913_vm15 = vcmp.eq.s32.totalorder %v908_v59, 1  ;;  %v4504_v33 = vsel %vm3740_vm13, 4294967295, %v4503_v33  ;;  %vm4506_vm5 = vmmov %vm4505_vm6 }
 0x614   : > { %v2912_v14 = vpop.permute.xlu0 %2911  ;;  %v2909_v15 = vunpack.i.h.bf16 %v2907_v12  ;;  %v2908_v16 = vunpack.i.l.bf16 %v2907_v12  ;;  %2532 = vmatprep.subr.msk.bf16.mxu1 %vm3708_vm0, %v2531_v6  ;;  %v903_v23 = vsel %vm4505_vm6, %v2904_v62, %v2899_v54  ;;  %v902_v24 = vsel %vm4506_vm5, %v2903_v63, %v2898_v56  ;;  %vm3757_vm14 = vmpackc.low %vm913_vm15, %vm913_vm15 }
 0x615   : > { %v2914_v21 = vunpack.i.h.bf16 %v2912_v14  ;;  %v2913_v30 = vunpack.i.l.bf16 %v2912_v14  ;;  %v2537_v25 = vpack.c.bf16 %v901_v9, %v900_v11  ;;  %vm4507_vm1 = vcmp.lt.s32.totalorder %v3365_v10, 111  ;;  %vm3761_vm6 = vmpackc.low %vm1126_vm11, %vm1126_vm11 }
 0x616   : > { %vm4508_vm2 = vmmov %vm4507_vm1  ;;  %v4509_v46 = vmov 0  ;;  %v2540_v31 = vpack.c.bf16 %v903_v23, %v902_v24  ;;  %v4511_v34 = vmov 0  ;;  %vm1125_vm5 = vcmp.eq.s32.totalorder %v1120_v36, 1 }
 0x617   : > { %v1115_v26 = vsel %vm4507_vm1, %v2914_v21, %v2909_v15  ;;  %v1114_v27 = vsel %vm4508_vm2, %v2913_v30, %v2908_v16  ;;  %2535 = vmatpush1.bf16.msk.msra.mxu1 %vm3733_vm7, %v2534_v18  ;;  %v4510_v46 = vsel %vm3757_vm14, 4294967295, %v4509_v46  ;;  %v4512_v34 = vsel %vm3761_vm6, 4294967295, %v4511_v34  ;;  %vm4513_vm2 = vmmov %vm4507_vm1 }
 0x618   : > { %2538 = vmatprep.subr.msk.bf16.mxu1 %vm3740_vm13, %v2537_v25  ;;  %v1113_v35 = vsel %vm4507_vm1, %v2909_v15, %v2914_v21  ;;  %v1112_v38 = vsel %vm4513_vm2, %v2908_v16, %v2913_v30  ;;  %v2543_v28 = vpack.c.bf16 %v1115_v26, %v1114_v27  ;;  %vm3773_vm15 = vmpackc.low %vm1125_vm5, %vm1125_vm5  ;;  %v4514_v32 = vmov 0 }
 0x619   : > { %v4515_v32 = vsel %vm3773_vm15, 4294967295, %v4514_v32  ;;  %v2546_v37 = vpack.c.bf16 %v1113_v35, %v1112_v38  ;;  %vm4516_vm11 = vcmask 130048   ;;  %vm4517_vm5 = vmmov 0  }
 0x61a   : > { %v1262_v15 = vmul.u32 4, %v3362_v8  ;;  %v1240_v24 = vmul.u32 4, %v3365_v10  ;;  %v1238_v26 = vadd.s32 16, %v3362_v8  ;;  %v1239_v27 = vadd.s32 24, %v3362_v8 }
 0x61b   : > { %2541 = vmatpush1.bf16.msk.msra.mxu1 %vm3757_vm14, %v2540_v31  ;;  %vm4518_vm13 = vcmask 64512  }
 0x61c   : > { %2544 = vmatprep.subr.msk.bf16.mxu1 %vm3761_vm6, %v2543_v28  ;;  %v1264_v16 = vadd.s32 4, %v1262_v15  ;;  %vm1263_vm1 = vcmp.ge.s32.totalorder %v3365_v10, %v1262_v15  ;;  %v1245_v25 = vadd.s32 4, %v1240_v24  ;;  %vm1243_vm8 = vcmp.ge.s32.totalorder %v1238_v26, %v1240_v24 }
 0x61d   : > { %vm1244_vm0 = vcmp.ge.s32.totalorder %v1239_v27, %v1240_v24 }
 0x61e   : > { %vm1265_vm2 = vcmp.lt.s32.totalorder %v3365_v10, %v1264_v16  ;;  %vm1247_vm6 = vcmp.lt.s32.totalorder %v3374_v17, %v1245_v25  ;;  %vm1248_vm14 = vcmp.lt.s32.totalorder %v1238_v26, %v1245_v25  ;;  %vm1249_vm12 = vcmp.lt.s32.totalorder %v1239_v27, %v1245_v25 }
 0x61f   : > { %2547 = vmatpush2.bf16.msk.msra.mxu1 %vm3773_vm15, %v2546_v37  ;;  %vm4430_vm15 = vcmask 261120   ;;  %vm1252_vm7 = vmand %vm1243_vm8, %vm1248_vm14 }
 0x620   : > { %2744 = vmatprep.subr.mxu1 %v3217_v0  ;;  %v1159_v49 = vpop.permute.xlu1 %1158  ;;  %vm1253_vm10 = vmand %vm1244_vm0, %vm1249_vm12 }
 0x621   : > { %v1154_v52 = vpop.permute.xlu0 %1153  ;;  %v3852_v28 = vsel %vm1253_vm10, 1.0, %v3217_v0  ;;  %vm4522_vm10 = vcmask 261120  }
 0x622   : > { %1218 = vmatmul.mubr.bf16.vlgmr.msra.gmra.mxu1 %v3077_v40 }
 0x623   : > { %2549 = vmatprep.mubr.msk.bf16.mxu1 %vm4516_vm11, %v3078_v42  ;;  %vm1266_vm11 = vmand %vm1263_vm1, %vm1265_vm2  ;;  %vm1241_vm1 = vcmp.ge.s32.totalorder %v3362_v8, %v1240_v24  ;;  %vm1242_vm2 = vcmp.ge.s32.totalorder %v3374_v17, %v1240_v24  ;;  %v1702_v24 = vld [vmem:[%s4382_s7 + $0x18] sm:$0xff] }
 0x624   : > { %v1149_v58 = vpop.permute.xlu1 %1148  ;;  %v3822_v36 = vsel %vm1266_vm11, 1.0, %v3217_v0  ;;  %vm1246_vm11 = vcmp.lt.s32.totalorder %v3362_v8, %v1245_v25  ;;  %v3844_v8 = vsel %vm1252_vm7, 1.0, %v3217_v0  ;;  %v1734_v25 = vld [vmem:[%s4383_s8 + $0x18] sm:$0xff] }
 0x625   : > { %v1144_v6 = vpop.permute.xlu0 %1143  ;;  %vm1250_vm9 = vmand %vm1241_vm1, %vm1246_vm11 }
 0x626   : > { %v3836_v31 = vsel %vm1250_vm9, 1.0, %v3217_v0  ;;  %vm4519_vm9 = vmmov %vm4518_vm13 }
 0x627   : > { %2757 = vmatprep.mubr.msk.f32.mxu0 %vm4518_vm13, %v3836_v31  ;;  %vm4520_vm8 = vmmov %vm4519_vm9 }
 0x628   : > { %vm4521_vm12 = vmmov %vm4520_vm8 }
 0x629   : > { %vm4523_vm7 = vmmov %vm4520_vm8 }
 0x62a   : > { %1228 = vmatmul.mubr.bf16.gmra.mxu1 %v3080_v47  ;;  %vm4524_vm0 = vmmov %vm4523_vm7 }
 0x62b   : > { %2752 = vmatprep.mubr.msk.f32.mxu1 %vm4517_vm5, %v3217_v0  ;;  %vm4525_vm13 = vmmov %vm4524_vm0 }
 0x62c   : > { %vm4526_vm14 = vmmov %vm4524_vm0 }
 0x6e2   : > { %v1219_v43 = vpop.f32.mrf.mxu1 }
 0x6e3   : > { %v3812_v12 = vadd.f32 %v1219_v43, %v1144_v6 }
 0x6e4   : > { %v1221_v44 = vpop.f32.mrf.mxu1 }
 0x6e5   : > { %v3806_v7 = vadd.f32 %v1221_v44, %v1144_v6 }
 0x6e6   : > { %v1223_v48 = vpop.f32.mrf.mxu1 }
 0x6e7   : > { %v3800_v2 = vadd.f32 %v1223_v48, %v1149_v58  ;;  %v1269_v14 = vadd.f32 %v3806_v7, %v3812_v12 }
 0x6e8   : > { %v1225_v50 = vpop.f32.mrf.mxu1 }
 0x6e9   : > { %v3796_v60 = vadd.f32 %v1225_v50, %v1149_v58 }
 0x6ea   : > { %v1229_v51 = vpop.f32.mrf.mxu1 }
 0x6eb   : > { %v3792_v54 = vadd.f32 %v1229_v51, %v1154_v52  ;;  %v1272_v11 = vadd.f32 %v3796_v60, %v3800_v2 }
 0x6ec   : > { %v1231_v53 = vpop.f32.mrf.mxu1 }
 0x6ed   : > { %v3794_v56 = vadd.f32 %v1231_v53, %v1154_v52 }
 0x6ee   : > { %v1233_v59 = vpop.f32.mrf.mxu1 }
 0x6ef   : > { %v1275_v62 = vadd.f32 %v3794_v56, %v3792_v54  ;;  %v3802_v3 = vadd.f32 %v1233_v59, %v1159_v49 }
 0x6f0   : > { %v1235_v63 = vpop.f32.mrf.mxu1 }
 0x6f1   : > { %v3804_v4 = vadd.f32 %v1235_v63, %v1159_v49  ;;  %1276 = vadd.xlane.f32.xlu0 %v1275_v62 }
 0x6f3   : > { %v1278_v9 = vadd.f32 %v3804_v4, %v3802_v3 }
 0x6f5   : > { %1279 = vadd.xlane.f32.xlu1 %v1278_v9  ;;  %1273 = vadd.xlane.f32.xlu0 %v1272_v11 }
 0x6f9   : > { %1270 = vadd.xlane.f32.xlu1 %v1269_v14 }
 0x77a   : > { %v1277_v18 = vpop.xlane.xlu0 %1276 }
 0x77e   : > { %v1280_v21 = vpop.xlane.xlu1 %1279  ;;  %v1274_v30 = vpop.xlane.xlu0 %1273 }
 0x77f   : > { %2745 = vmatpush3.msra.mxu1 %v1280_v21 }
 0x780   : > { %2746 = vmatprep.subr.mxu1 %v3217_v0 }
 0x781   : > { %2747 = vmatpush3.msra.mxu1 %v1277_v18 }
 0x782   : > { %2748 = vmatprep.subr.mxu1 %v3217_v0  ;;  %v1271_v23 = vpop.xlane.xlu1 %1270 }
 0x783   : > { %2749 = vmatpush3.msra.mxu1 %v1274_v30 }
 0x784   : > { %2750 = vmatprep.subr.mxu1 %v3217_v0 }
 0x785   : > { %2751 = vmatpush3.msra.mxu1 %v1271_v23  ;;  %v1733_v23 = vld [vmem:[%s4383_s8 + $0x10] sm:$0xff] }
 0x786   : > { %2753 = vmatmul.mubr.msk.f32.vlgmr.msra.gmra.mxu1 %vm4430_vm15, %v3822_v36  ;;  %vm1251_vm15 = vmand %vm1242_vm2, %vm1247_vm6  ;;  %vm4535_vm6 = vcmp.lt.s32.totalorder %v3365_v10, 1 }
 0x787   : > { %2264 = vmatprep.mubr.bf16.mxu1 %v3219_v22  ;;  %v3841_v17 = vsel %vm1251_vm15, 1.0, %v3217_v0  ;;  %vm4536_vm15 = vmmov %vm4535_vm6 }
 0x846   : > { %v1351_v35 = vpop.f32.mrf.mxu1 }
 0x847   : > { %2755 = vmatprep.subr.mxu0 %v1351_v35 }
 0x848   : > { %2756 = vmatpush3.msra.mxu0 %v1351_v35  ;;  %v2754_v38 = vpop.f32.mrf.mxu1 }
 0x849   : > { %2758 = vmatmul.mubr.msk.f32.vlgmr.msra.gmra.mxu0 %vm4519_vm9, %v3841_v17  ;;  %2763 = vmatprep.subr.mxu0 %v3217_v0 }
 0x84a   : > { %2760 = vmatprep.mubr.msk.f32.mxu0 %vm4520_vm8, %v3844_v8 }
 0x84d   : > { %2761 = vmatmul.mubr.msk.f32.gmra.mxu0 %vm4521_vm12, %v3852_v28  ;;  %vm4543_vm12 = vcmp.lt.s32.totalorder %v3365_v10, 15 }
 0x84e   : > { %2771 = vmatprep.mubr.msk.f32.mxu0 %vm4517_vm5, %v3217_v0  ;;  %vm4537_vm5 = vmmov %vm4535_vm6 }
 0x84f   : > { %vm4538_vm1 = vmmov %vm4537_vm5 }
 0x850   : > { %vm4539_vm2 = vmmov %vm4538_vm1 }
 0x851   : > { %vm4540_vm11 = vmmov %vm4538_vm1 }
 0x852   : > { %vm4541_vm9 = vmmov %vm4538_vm1 }
 0x853   : > { %vm4542_vm8 = vmmov %vm4538_vm1 }
 0x909   : > { %v2759_v37 = vpop.f32.mrf.mxu0 }
 0x90a   : > { %v1453_v49 = vmul.f32 0.0009765625, %v2759_v37 }
 0x90b   : > { %v1433_v40 = vpop.f32.mrf.mxu0 }
 0x90c   : > { %v1452_v48 = vmul.f32 0.0009765625, %v1433_v40 }
 0x90d   : > { %v2762_v42 = vpop.f32.mrf.mxu0 }
 0x90e   : > { %v1455_v47 = vmul.f32 0.0009765625, %v2762_v42 }
 0x90f   : > { %v1443_v43 = vpop.f32.mrf.mxu0 }
 0x910   : > { %v1454_v44 = vmul.f32 0.0009765625, %v1443_v43  ;;  %1473 = vperm.xlu0 %2834, %v1455_v47  }
 0x912   : > { %1468 = vperm.xlu1 %2833, %v1454_v44  }
 0x914   : > { %1458 = vperm.xlu0 %2834, %v1452_v48  }
 0x916   : > { %1463 = vperm.xlu1 %2833, %v1453_v49  }
 0x98b   : > { %v1474_v50 = vpop.permute.xlu0 %1473 }
 0x98c   : > { %v3859_v51 = vsub.f32 %v3802_v3, %v1474_v50  ;;  %v3862_v52 = vsub.f32 %v3804_v4, %v1474_v50 }
 0x98d   : > { %v1469_v53 = vpop.permute.xlu1 %1468 }
 0x98e   : > { %v3865_v58 = vsub.f32 %v3792_v54, %v1469_v53  ;;  %v3868_v59 = vsub.f32 %v3794_v56, %v1469_v53  ;;  %v1490_v62 = vmul.f32 %v3859_v51, %v3859_v51  ;;  %v1491_v63 = vmul.f32 %v3862_v52, %v3862_v52 }
 0x98f   : > { %v1459_v6 = vpop.permute.xlu0 %1458 }
 0x990   : > { %v3875_v3 = vsub.f32 %v3812_v12, %v1459_v6  ;;  %v3878_v4 = vsub.f32 %v3806_v7, %v1459_v6  ;;  %v1501_v9 = vadd.f32 %v1491_v63, %v1490_v62  ;;  %v1488_v54 = vmul.f32 %v3865_v58, %v3865_v58  ;;  %v1699_v6 = vld [vmem:[%s4382_s7] sm:$0xff] }
 0x991   : > { %v1464_v11 = vpop.permute.xlu1 %1463  ;;  %v1489_v56 = vmul.f32 %v3868_v59, %v3868_v59 }
 0x992   : > { %v3885_v14 = vsub.f32 %v3800_v2, %v1464_v11  ;;  %v3888_v15 = vsub.f32 %v3796_v60, %v1464_v11  ;;  %1502 = vadd.xlane.f32.xlu1 %v1501_v9  ;;  %v1484_v12 = vmul.f32 %v3875_v3, %v3875_v3  ;;  %v1485_v7 = vmul.f32 %v3878_v4, %v3878_v4  ;;  %v1701_v60 = vld [vmem:[%s4382_s7 + $0x10] sm:$0xff]  ;;  %v1700_v9 = vld [vmem:[%s4382_s7 + $0x8] sm:$0xff] }
 0x993   : > { %v1498_v16 = vadd.f32 %v1489_v56, %v1488_v54  ;;  %v1731_v54 = vld [vmem:[%s4383_s8] sm:$0xff]  ;;  %v1732_v11 = vld [vmem:[%s4383_s8 + $0x8] sm:$0xff] }
 0x994   : > { %v1492_v18 = vadd.f32 %v1485_v7, %v1484_v12  ;;  %v1486_v21 = vmul.f32 %v3885_v14, %v3885_v14  ;;  %v1487_v30 = vmul.f32 %v3888_v15, %v3888_v15 }
 0x995   : > { %1499 = vadd.xlane.f32.xlu0 %v1498_v16 }
 0x996   : > { %1493 = vadd.xlane.f32.xlu1 %v1492_v18  ;;  %v1495_v2 = vadd.f32 %v1487_v30, %v1486_v21 }
 0x999   : > { %1496 = vadd.xlane.f32.xlu0 %v1495_v2 }
 0x9a7   : > { %1715 = vperm.xlu1 %2833, %v1701_v60  }
 0x9ab   : > { %1747 = vperm.xlu1 %2833, %v1733_v23  }
 0x9af   : > { %1720 = vperm.xlu0 %2834, %v1702_v24  }
 0x9b3   : > { %1752 = vperm.xlu0 %2834, %v1734_v25  }
 0xa1b   : > { %v1503_v26 = vpop.xlane.xlu1 %1502 }
 0xa1c   : > { %2764 = vmatpush3.msra.mxu0 %v1503_v26 }
 0xa1d   : > { %2765 = vmatprep.subr.mxu0 %v3217_v0 }
 0xa1e   : > { %v1500_v27 = vpop.xlane.xlu0 %1499 }
 0xa1f   : > { %2766 = vmatpush3.msra.mxu0 %v1500_v27  ;;  %v1494_v38 = vpop.xlane.xlu1 %1493 }
 0xa20   : > { %2767 = vmatprep.subr.mxu0 %v3217_v0 }
 0xa22   : > { %v1497_v35 = vpop.xlane.xlu0 %1496 }
 0xa23   : > { %2768 = vmatpush3.msra.mxu0 %v1497_v35  ;;  %v1716_v56 = vpop.permute.xlu1 %1715 }
 0xa24   : > { %2769 = vmatprep.subr.mxu0 %v3217_v0 }
 0xa25   : > { %2770 = vmatpush3.msra.mxu0 %v1494_v38 }
 0xa26   : > { %2772 = vmatmul.mubr.msk.f32.vlgmr.msra.gmra.mxu0 %vm4522_vm10, %v3822_v36  ;;  %vm4544_vm10 = vmmov %vm4543_vm12 }
 0xa27   : > { %2776 = vmatprep.mubr.msk.f32.mxu0 %vm4523_vm7, %v3836_v31  ;;  %v1748_v7 = vpop.permute.xlu1 %1747  ;;  %vm4545_vm7 = vmmov %vm4544_vm10 }
 0xa2a   : > { %v1721_v12 = vpop.permute.xlu0 %1720 }
 0xa2e   : > { %v1753_v16 = vpop.permute.xlu0 %1752 }
 0xae6   : > { %v1570_v37 = vpop.f32.mrf.mxu0 }
 0xae7   : > { %2774 = vmatprep.subr.mxu0 %v1570_v37 }
 0xae8   : > { %2775 = vmatpush3.msra.mxu0 %v1570_v37  ;;  %v2773_v40 = vpop.f32.mrf.mxu0 }
 0xae9   : > { %2777 = vmatmul.mubr.msk.f32.vlgmr.msra.gmra.mxu0 %vm4524_vm0, %v3841_v17  ;;  %vm4546_vm0 = vmmov %vm4545_vm7 }
 0xaea   : > { %2779 = vmatprep.mubr.msk.f32.mxu0 %vm4525_vm13, %v3844_v8  ;;  %vm4547_vm13 = vmmov %vm4546_vm0 }
 0xaed   : > { %2780 = vmatmul.mubr.msk.f32.gmra.mxu0 %vm4526_vm14, %v3852_v28  ;;  %vm4549_vm14 = vmmov %vm4546_vm0 }
 0xba9   : > { %v2778_v0 = vpop.f32.mrf.mxu0 }
 0xbaa   : > { %v1660_v42 = vmul.f32 0.0009765625, %v2778_v0 }
 0xbab   : > { %v1640_v47 = vpop.f32.mrf.mxu0 }
 0xbac   : > { %v1664_v36 = vadd.f32 1e-05, %v1660_v42  ;;  %v1659_v43 = vmul.f32 0.0009765625, %v1640_v47 }
 0xbad   : > { %v2781_v44 = vpop.f32.mrf.mxu0 }
 0xbae   : > { %3111 = vrsqrt.f32 %v1664_v36  ;;  %v1663_v31 = vadd.f32 1e-05, %v1659_v43  ;;  %v1662_v48 = vmul.f32 0.0009765625, %v2781_v44 }
 0xbaf   : > { %v1650_v49 = vpop.f32.mrf.mxu0 }
 0xbb0   : > { %3113 = vrsqrt.f32 %v1663_v31  ;;  %v1666_v50 = vadd.f32 1e-05, %v1662_v48  ;;  %v1661_v53 = vmul.f32 0.0009765625, %v1650_v49 }
 0xbb2   : > { %v1665_v17 = vadd.f32 1e-05, %v1661_v53  ;;  %3115 = vrsqrt.f32 %v1666_v50 }
 0xbb4   : > { %3117 = vrsqrt.f32 %v1665_v17 }
 0xbbb   : > { %v3112_v8 = vpop.eup %3111 }
 0xbbc   : > { %1678 = vperm.xlu0 %2834, %v3112_v8  }
 0xbbd   : > { %v3114_v62 = vpop.eup %3113 }
 0xbbe   : > { %1673 = vperm.xlu1 %2833, %v3114_v62  }
 0xbbf   : > { %v3116_v28 = vpop.eup %3115 }
 0xbc1   : > { %v3118_v63 = vpop.eup %3117 }
 0xbc2   : > { %1688 = vperm.xlu1 %2833, %v3116_v28   ;;  %1683 = vperm.xlu0 %2834, %v3118_v63  }
 0xbc6   : > { %1705 = vperm.xlu1 %2833, %v1699_v6   ;;  %1710 = vperm.xlu0 %2834, %v1700_v9  }
 0xbca   : > { %1737 = vperm.xlu1 %2833, %v1731_v54   ;;  %1742 = vperm.xlu0 %2834, %v1732_v11  }
 0xc37   : > { %v1679_v18 = vpop.permute.xlu0 %1678 }
 0xc38   : > { %v1693_v37 = vmul.f32 %v1679_v18, %v3885_v14  ;;  %v1694_v40 = vmul.f32 %v1679_v18, %v3888_v15 }
 0xc39   : > { %v1674_v21 = vpop.permute.xlu1 %1673 }
 0xc3a   : > { %v1691_v0 = vmul.f32 %v1674_v21, %v3875_v3 }
 0xc3d   : > { %v1684_v30 = vpop.permute.xlu0 %1683  ;;  %v1689_v2 = vpop.permute.xlu1 %1688 }
 0xc3e   : > { %v1695_v60 = vmul.f32 %v1684_v30, %v3865_v58  ;;  %v1696_v23 = vmul.f32 %v1684_v30, %v3868_v59  ;;  %v1697_v24 = vmul.f32 %v1689_v2, %v3859_v51  ;;  %v1698_v25 = vmul.f32 %v1689_v2, %v3862_v52 }
 0xc3f   : > { %v1692_v52 = vmul.f32 %v1674_v21, %v3878_v4 }
 0xc40   : > { %v1727_v26 = vmul.f32 %v1716_v56, %v1695_v60  ;;  %v1728_v27 = vmul.f32 %v1716_v56, %v1696_v23  ;;  %v1729_v35 = vmul.f32 %v1721_v12, %v1697_v24  ;;  %v1730_v38 = vmul.f32 %v1721_v12, %v1698_v25 }
 0xc41   : > { %v1711_v42 = vpop.permute.xlu0 %1710  ;;  %v1706_v47 = vpop.permute.xlu1 %1705 }
 0xc42   : > { %v3942_v36 = vadd.f32 %v1748_v7, %v1727_v26  ;;  %v3944_v58 = vadd.f32 %v1748_v7, %v1728_v27  ;;  %v3946_v59 = vadd.f32 %v1753_v16, %v1729_v35  ;;  %v3948_v51 = vadd.f32 %v1753_v16, %v1730_v38 }
 0xc43   : > { %v1725_v43 = vmul.f32 %v1711_v42, %v1693_v37  ;;  %v1726_v44 = vmul.f32 %v1711_v42, %v1694_v40  ;;  %v1723_v31 = vmul.f32 %v1706_v47, %v1691_v0  ;;  %v1724_v49 = vmul.f32 %v1706_v47, %v1692_v52 }
 0xc44   : > { %v2569_v14 = vmul.f32 -1.442695, %v3942_v36  ;;  %v2570_v15 = vmul.f32 -1.442695, %v3944_v58  ;;  %v2571_v3 = vmul.f32 -1.442695, %v3946_v59 }
 0xc45   : > { %v2572_v48 = vmul.f32 -1.442695, %v3948_v51  ;;  %v1743_v50 = vpop.permute.xlu0 %1742  ;;  %v1738_v53 = vpop.permute.xlu1 %1737 }
 0xc46   : > { %3119 = vpow2.f32 %v2569_v14  ;;  %v1757_v17 = vadd.f32 %v1743_v50, %v1725_v43  ;;  %v1758_v8 = vadd.f32 %v1743_v50, %v1726_v44  ;;  %v1755_v62 = vadd.f32 %v1738_v53, %v1723_v31 }
 0xc47   : > { %3121 = vpow2.f32 %v2570_v15  ;;  %v1756_v4 = vadd.f32 %v1738_v53, %v1724_v49 }
 0xc48   : > { %3123 = vpow2.f32 %v2571_v3  ;;  %v2567_v28 = vmul.f32 -1.442695, %v1757_v17  ;;  %v2568_v63 = vmul.f32 -1.442695, %v1758_v8  ;;  %v2565_v6 = vmul.f32 -1.442695, %v1755_v62 }
 0xc49   : > { %3125 = vpow2.f32 %v2572_v48  ;;  %v2566_v9 = vmul.f32 -1.442695, %v1756_v4 }
 0xc4a   : > { %3127 = vpow2.f32 %v2567_v28  ;;  %v3085_v28 = vld [vmem:[%s4384_s9 + $0x4] ss:$12 sps:$4 sm:$0xff]  }
 0xc4b   : > { %3129 = vpow2.f32 %v2568_v63  ;;  %v2121_v63 = vld [vmem:[%s4385_s10 + $0x10] sm:$0xff]  ;;  %2211 = vmatprep.mubr.bf16.mxu0 %v3085_v28 }
 0xc4c   : > { %3131 = vpow2.f32 %v2565_v6  ;;  %v2122_v6 = vld [vmem:[%s4385_s10 + $0x18] sm:$0xff] }
 0xc4d   : > { %3133 = vpow2.f32 %v2566_v9  ;;  %v2291_v9 = vld [vmem:[%s4387_s12] sm:$0xff] }
 0xc53   : > { %v3120_v54 = vpop.eup %3119 }
 0xc54   : > { %v3122_v11 = vpop.eup %3121  ;;  %v1791_v56 = vadd.f32 1.0, %v3120_v54  ;;  %v2292_v54 = vld [vmem:[%s4387_s12 + $0x8] sm:$0xff] }
 0xc55   : > { %v3124_v12 = vpop.eup %3123  ;;  %v1792_v7 = vadd.f32 1.0, %v3122_v11  ;;  %v2293_v11 = vld [vmem:[%s4387_s12 + $0x10] sm:$0xff] }
 0xc56   : > { %v3126_v16 = vpop.eup %3125  ;;  %3135 = vrcp.f32 %v1791_v56  ;;  %v1793_v18 = vadd.f32 1.0, %v3124_v12  ;;  %v2294_v56 = vld [vmem:[%s4387_s12 + $0x18] sm:$0xff] }
 0xc57   : > { %v3128_v21 = vpop.eup %3127  ;;  %3137 = vrcp.f32 %v1792_v7  ;;  %v1794_v30 = vadd.f32 1.0, %v3126_v16 }
 0xc58   : > { %v3130_v2 = vpop.eup %3129  ;;  %3139 = vrcp.f32 %v1793_v18  ;;  %v1789_v60 = vadd.f32 1.0, %v3128_v21 }
 0xc59   : > { %v3132_v23 = vpop.eup %3131  ;;  %3141 = vrcp.f32 %v1794_v30  ;;  %v1790_v24 = vadd.f32 1.0, %v3130_v2 }
 0xc5a   : > { %v3134_v25 = vpop.eup %3133  ;;  %3143 = vrcp.f32 %v1789_v60  ;;  %v1787_v26 = vadd.f32 1.0, %v3132_v23 }
 0xc5b   : > { %3145 = vrcp.f32 %v1790_v24  ;;  %v1788_v27 = vadd.f32 1.0, %v3134_v25 }
 0xc5c   : > { %3147 = vrcp.f32 %v1787_v26 }
 0xc5d   : > { %3149 = vrcp.f32 %v1788_v27 }
 0xc63   : > { %v3136_v35 = vpop.eup %3135 }
 0xc64   : > { %v3138_v38 = vpop.eup %3137  ;;  %v3964_v3 = vmul.f32 %v3136_v35, %v3942_v36 }
 0xc65   : > { %v3140_v37 = vpop.eup %3139  ;;  %v3969_v48 = vmul.f32 %v3138_v38, %v3944_v58 }
 0xc66   : > { %v3142_v40 = vpop.eup %3141  ;;  %v3972_v49 = vmul.f32 %v3140_v37, %v3946_v59 }
 0xc67   : > { %v3144_v0 = vpop.eup %3143  ;;  %v3975_v50 = vmul.f32 %v3142_v40, %v3948_v51 }
 0xc68   : > { %v3146_v42 = vpop.eup %3145  ;;  %v3955_v47 = vmul.f32 %v3144_v0, %v1757_v17  ;;  %v1965_v58 = vpack.c.bf16 %v3972_v49, %v3964_v3  ;;  %v2935_v17 = vpack.i.bf16 %v3972_v49, %v3964_v3 }
 0xc69   : > { %v3148_v52 = vpop.eup %3147  ;;  %v3957_v43 = vmul.f32 %v3146_v42, %v1758_v8  ;;  %v1966_v36 = vpack.c.bf16 %v3975_v50, %v3969_v48  ;;  %v2945_v8 = vpack.i.bf16 %v3975_v50, %v3969_v48 }
 0xc6a   : > { %v3150_v44 = vpop.eup %3149  ;;  %v3959_v14 = vmul.f32 %v3148_v52, %v1755_v62  ;;  %v2119_v62 = vld [vmem:[%s4385_s10] sm:$0xff] }
 0xc6b   : > { %v3961_v15 = vmul.f32 %v3150_v44, %v1756_v4  ;;  %v2120_v4 = vld [vmem:[%s4385_s10 + $0x8] sm:$0xff] }
 0xc6c   : > { %v2915_v31 = vpack.i.bf16 %v3955_v47, %v3959_v14  ;;  %v1963_v51 = vpack.c.bf16 %v3955_v47, %v3959_v14  ;;  %v3090_v47 = vld [vmem:[%s4386_s11 + $0x8] sm:$0xff]  }
 0xc6d   : > { %v2920_v53 = vpack.i.bf16 %v3957_v43, %v3961_v15  ;;  %v1964_v59 = vpack.c.bf16 %v3957_v43, %v3961_v15  ;;  %v3089_v43 = vld [vmem:[%s4384_s9 + $0x18] ss:$12 sps:$4 sm:$0xff]  }
 0xc6e   : > { %2916 = vrot.lane.b32.xlu1 %v2915_v31, %s4527_s15 }
 0xc6f   : > { %2921 = vrot.lane.b32.xlu0 %v2920_v53, %s4527_s15 }
 0xc72   : > { %2926 = vrot.lane.b32.xlu1 %v2915_v31, %s4528_s22 }
 0xc73   : > { %2931 = vrot.lane.b32.xlu0 %v2920_v53, %s4528_s22 }
 0xc76   : > { %2936 = vrot.lane.b32.xlu1 %v2935_v17, %s4527_s15 }
 0xc77   : > { %2946 = vrot.lane.b32.xlu0 %v2945_v8, %s4527_s15  ;;  %s4313_s15 = scalar_lea.vmem [#allocation2], %s2480_s4 }
 0xc7a   : > { %2941 = vrot.lane.b32.xlu1 %v2915_v31, %s4529_s23 }
 0xc7b   : > { %2951 = vrot.lane.b32.xlu0 %v2920_v53, %s4529_s23 }
 0xc7e   : > { %2956 = vrot.lane.b32.xlu1 %v2935_v17, %s4528_s22 }
 0xc7f   : > { %2966 = vrot.lane.b32.xlu0 %v2945_v8, %s4528_s22  ;;  %s2687_s22 = sshll.u32 %s3321_s29, 10  ;;  %s4334_s29 = scalar_lea.sflag [#allocation3], %s431_s3 }
 0xc82   : > { %2961 = vrot.lane.b32.xlu1 %v2915_v31, %s4530_s30 }
 0xc83   : > { %2971 = vrot.lane.b32.xlu0 %v2920_v53, %s4530_s30 }
 0xc86   : > { %2976 = vrot.lane.b32.xlu1 %v2935_v17, %s4529_s23 }
 0xc87   : > { %2986 = vrot.lane.b32.xlu0 %v2945_v8, %s4529_s23 }
 0xc8a   : > { %2981 = vrot.lane.b32.xlu1 %v2915_v31, %s4531_s16 }
 0xc8b   : > { %2991 = vrot.lane.b32.xlu0 %v2920_v53, %s4531_s16 }
 0xc8e   : > { %2996 = vrot.lane.b32.xlu1 %v2935_v17, %s4530_s30 }
 0xc8f   : > { %3006 = vrot.lane.b32.xlu0 %v2945_v8, %s4530_s30  ;;  %s2414_s30 = sshll.u32 %s4313_s15, 4  ;;  %s4329_s30 = int_to_ptr.vmem [resolvable:$true] %s2414_s30 }
 0xc90   : > { %s3155_s1 = scalar_lea.vmem %s4329_s30, 1024 }
 0xc91   : > { %p3156_p11 = scmp.ne.s32.totalorder %s4329_s30, %s3155_s1 }
 0xc92   : > { %3001 = vrot.lane.b32.xlu1 %v2915_v31, %s4532_s20 }
 0xc93   : > { %3011 = vrot.lane.b32.xlu0 %v2920_v53, %s4532_s20  ;;  %p3157_p12 = pnand %p3156_p11, %p3338_p5 }
 0xc95   : > { %p3158_p13 = pneg %p3157_p12 }
 0xc96   : > { %3016 = vrot.lane.b32.xlu1 %v2935_v17, %s4531_s16 }
 0xc97   : > { %3021 = vrot.lane.b32.xlu0 %v2945_v8, %s4531_s16 }
 0xc9a   : > { %3026 = vrot.lane.b32.xlu1 %v2935_v17, %s4532_s20 }
 0xc9b   : > { %3031 = vrot.lane.b32.xlu0 %v2945_v8, %s4532_s20 }
 0xc9e   : > { %3036 = vrot.lane.b32.xlu1 %v2935_v17, %s4533_s21 }
 0xc9f   : > { %3046 = vrot.lane.b32.xlu0 %v2945_v8, %s4533_s21 }
 0xca2   : > { %3041 = vrot.lane.b32.xlu1 %v2915_v31, %s4533_s21 }
 0xca3   : > { %3051 = vrot.lane.b32.xlu0 %v2920_v53, %s4533_s21  ;;  %s4326_s21 = scalar_lea.hbm %s4388_s13, %s2687_s22 }
 0xca6   : > { %3056 = vrot.lane.b32.xlu1 %v2935_v17, %s4534_s0 }
 0xca7   : > { %3066 = vrot.lane.b32.xlu0 %v2945_v8, %s4534_s0 }
 0xcaa   : > { %3061 = vrot.lane.b32.xlu1 %v2915_v31, %s4534_s0 }
 0xcab   : > { %3071 = vrot.lane.b32.xlu0 %v2920_v53, %s4534_s0  ;;  %s3228_s0 = smov [#allocation2]  }
 0xcae   : > { %2125 = vperm.xlu1 %2833, %v2119_v62  }
 0xcaf   : > { %2130 = vperm.xlu0 %2834, %v2120_v4  }
 0xcb2   : > { %2135 = vperm.xlu1 %2833, %v2121_v63  }
 0xcb3   : > { %2140 = vperm.xlu0 %2834, %v2122_v6  }
 0xcb6   : > { %2297 = vperm.xlu1 %2833, %v2291_v9  }
 0xcb7   : > { %2302 = vperm.xlu0 %2834, %v2292_v54  }
 0xcba   : > { %2307 = vperm.xlu1 %2833, %v2293_v11  }
 0xcbb   : > { %2312 = vperm.xlu0 %2834, %v2294_v56  }
 0xce0   : > { %v2917_v12 = vpop.permute.xlu1 %2916 }
 0xce1   : > { %v2922_v7 = vpop.permute.xlu0 %2921  ;;  %v2919_v2 = vunpack.i.h.bf16 %v2917_v12  ;;  %v2918_v60 = vunpack.i.l.bf16 %v2917_v12 }
 0xce2   : > { %v2924_v21 = vunpack.i.h.bf16 %v2922_v7  ;;  %v2923_v30 = vunpack.i.l.bf16 %v2922_v7 }
 0xce4   : > { %v2927_v16 = vpop.permute.xlu1 %2926  ;;  %v1944_v38 = vsel %vm4535_vm6, %v2919_v2, %v2924_v21  ;;  %v1943_v37 = vsel %vm4536_vm15, %v2918_v60, %v2923_v30  ;;  %v1948_v8 = vsel %vm4541_vm9, %v2924_v21, %v2919_v2  ;;  %v1947_v62 = vsel %vm4542_vm8, %v2923_v30, %v2918_v60  ;;  %vm4550_vm6 = vmmov %vm4546_vm0 }
 0xce5   : > { %v2932_v18 = vpop.permute.xlu0 %2931  ;;  %v2586_v4 = vpack.c.bf16 %v1944_v38, %v1943_v37  ;;  %v2929_v6 = vunpack.i.h.bf16 %v2927_v16  ;;  %v2928_v9 = vunpack.i.l.bf16 %v2927_v16  ;;  %v2589_v7 = vpack.c.bf16 %v1948_v8, %v1947_v62 }
 0xce6   : > { %v2934_v28 = vunpack.i.h.bf16 %v2932_v18  ;;  %v2933_v63 = vunpack.i.l.bf16 %v2932_v18  ;;  %vm4552_vm15 = vnez %v4494_v57 }
 0xce8   : > { %v2937_v23 = vpop.permute.xlu1 %2936  ;;  %v1908_v18 = vsel %vm4543_vm12, %v2929_v6, %v2934_v28  ;;  %v1907_v16 = vsel %vm4544_vm10, %v2928_v9, %v2933_v63  ;;  %v1911_v38 = vsel %vm4550_vm6, %v2933_v63, %v2928_v9 }
 0xce9   : > { %v2947_v24 = vpop.permute.xlu0 %2946  ;;  %v2939_v25 = vunpack.i.h.bf16 %v2937_v23  ;;  %v2938_v26 = vunpack.i.l.bf16 %v2937_v23  ;;  %v2598_v37 = vpack.c.bf16 %v1908_v18, %v1907_v16 }
 0xcea   : > { %v2949_v27 = vunpack.i.h.bf16 %v2947_v24  ;;  %v2948_v35 = vunpack.i.l.bf16 %v2947_v24 }
 0xcec   : > { %v1946_v40 = vsel %vm4537_vm5, %v2939_v25, %v2949_v27  ;;  %v1950_v0 = vsel %vm4538_vm1, %v2949_v27, %v2939_v25  ;;  %v1945_v42 = vsel %vm4539_vm2, %v2938_v26, %v2948_v35  ;;  %v1949_v52 = vsel %vm4540_vm11, %v2948_v35, %v2938_v26  ;;  %v4062_v44 = vpop.permute.xlu1 %2941 }
 0xced   : > { %v2580_v31 = vpack.c.bf16 %v1946_v40, %v1945_v42  ;;  %v2583_v53 = vpack.c.bf16 %v1950_v0, %v1949_v52  ;;  %v2952_v17 = vpop.permute.xlu0 %2951  ;;  %v1912_v35 = vsel %vm4549_vm14, %v2934_v28, %v2929_v6  ;;  %v2944_v42 = vunpack.i.h.bf16 %v4062_v44 }
 0xcee   : > { %v2954_v40 = vunpack.i.h.bf16 %v2952_v17  ;;  %v2953_v0 = vunpack.i.l.bf16 %v2952_v17  ;;  %v2943_v52 = vunpack.i.l.bf16 %v4062_v44  ;;  %v2601_v62 = vpack.c.bf16 %v1912_v35, %v1911_v38 }
 0xcef   : > { %2581 = vmatprep.subr.msk.bf16.mxu0 %vm3627_vm4, %v2580_v31  ;;  %vm4553_vm5 = vcmp.lt.s32.totalorder %v3365_v10, 16 }
 0xcf0   : > { %2584 = vmatpush1.bf16.msk.msra.mxu0 %vm3652_vm3, %v2583_v53  ;;  %v2957_v54 = vpop.permute.xlu1 %2956  ;;  %v1872_v28 = vsel %vm4553_vm5, %v2944_v42, %v2954_v40  ;;  %vm4554_vm1 = vmmov %vm4553_vm5 }
 0xcf1   : > { %v2967_v11 = vpop.permute.xlu0 %2966  ;;  %v2959_v56 = vunpack.i.h.bf16 %v2957_v54  ;;  %v2958_v12 = vunpack.i.l.bf16 %v2957_v54  ;;  %2587 = vmatprep.subr.msk.bf16.mxu0 %vm3627_vm4, %v2586_v4  ;;  %vm4548_vm4 = vmmov %vm4546_vm0  ;;  %v1871_v44 = vsel %vm4554_vm1, %v2943_v52, %v2953_v0 }
 0xcf2   : > { %v2969_v21 = vunpack.i.h.bf16 %v2967_v11  ;;  %v2968_v30 = vunpack.i.l.bf16 %v2967_v11  ;;  %vm4555_vm2 = vmmov %vm4554_vm1 }
 0xcf3   : > { %vm4556_vm11 = vmmov %vm4554_vm1 }
 0xcf4   : > { %v1910_v2 = vsel %vm4545_vm7, %v2959_v56, %v2969_v21  ;;  %v1914_v60 = vsel %vm4546_vm0, %v2969_v21, %v2959_v56  ;;  %v1909_v23 = vsel %vm4547_vm13, %v2958_v12, %v2968_v30  ;;  %v1913_v20 = vsel %vm4548_vm4, %v2968_v30, %v2958_v12  ;;  %2590 = vmatpush1.bf16.msk.msra.mxu0 %vm3652_vm3, %v2589_v7  ;;  %v4088_v24 = vpop.permute.xlu1 %2961  ;;  %vm4557_vm9 = vmmov %vm4554_vm1 }
 0xcf5   : > { %v2592_v25 = vpack.c.bf16 %v1910_v2, %v1909_v23  ;;  %v2595_v26 = vpack.c.bf16 %v1914_v60, %v1913_v20  ;;  %v2972_v27 = vpop.permute.xlu0 %2971  ;;  %vm4551_vm3 = vnez %v4490_v41  ;;  %vm4558_vm8 = vmmov %vm4554_vm1  ;;  %v2610_v30 = vpack.c.bf16 %v1872_v28, %v1871_v44 }
 0xcf6   : > { %vm4559_vm12 = vmmov %vm4554_vm1  ;;  %v2974_v18 = vunpack.i.h.bf16 %v2972_v27  ;;  %v2973_v16 = vunpack.i.l.bf16 %v2972_v27  ;;  %v2964_v2 = vunpack.i.h.bf16 %v4088_v24  ;;  %v2963_v57 = vunpack.i.l.bf16 %v4088_v24 }
 0xcf7   : > { %2593 = vmatprep.subr.msk.bf16.mxu0 %vm4551_vm3, %v2592_v25  ;;  %v1876_v7 = vsel %vm4559_vm12, %v2954_v40, %v2944_v42  ;;  %vm4560_vm10 = vmmov %vm4554_vm1  ;;  %vm4561_vm7 = vnez %v4498_v1  ;;  %vm4562_vm0 = vnez %v4502_v45  ;;  %vm4563_vm13 = vcmp.lt.s32.totalorder %v3365_v10, 17 }
 0xcf8   : > { %2596 = vmatpush1.bf16.msk.msra.mxu0 %vm4552_vm15, %v2595_v26  ;;  %v2977_v29 = vpop.permute.xlu1 %2976  ;;  %v1875_v21 = vsel %vm4560_vm10, %v2953_v0, %v2943_v52  ;;  %v1836_v38 = vsel %vm4563_vm13, %v2964_v2, %v2974_v18  ;;  %vm4564_vm4 = vmmov %vm4563_vm13 }
 0xcf9   : > { %v2987_v31 = vpop.permute.xlu0 %2986  ;;  %v2979_v53 = vunpack.i.h.bf16 %v2977_v29  ;;  %v2978_v8 = vunpack.i.l.bf16 %v2977_v29  ;;  %2599 = vmatprep.subr.msk.bf16.mxu0 %vm4551_vm3, %v2598_v37  ;;  %v2613_v26 = vpack.c.bf16 %v1876_v7, %v1875_v21  ;;  %v1835_v24 = vsel %vm4564_vm4, %v2963_v57, %v2973_v16  ;;  %vm4565_vm14 = vmmov %vm4564_vm4 }
 0xcfa   : > { %v2989_v4 = vunpack.i.h.bf16 %v2987_v31  ;;  %v2988_v17 = vunpack.i.l.bf16 %v2987_v31  ;;  %vm4566_vm6 = vmmov %vm4564_vm4 }
 0xcfb   : > { %vm4567_vm3 = vmmov %vm4564_vm4 }
 0xcfc   : > { %v1874_v63 = vsel %vm4555_vm2, %v2979_v53, %v2989_v4  ;;  %v1878_v6 = vsel %vm4556_vm11, %v2989_v4, %v2979_v53  ;;  %v1873_v9 = vsel %vm4557_vm9, %v2978_v8, %v2988_v17  ;;  %v1877_v41 = vsel %vm4558_vm8, %v2988_v17, %v2978_v8  ;;  %2602 = vmatpush1.bf16.msk.msra.mxu0 %vm4552_vm15, %v2601_v62  ;;  %v4116_v54 = vpop.permute.xlu1 %2981  ;;  %vm4568_vm15 = vmmov %vm4567_vm3 }
 0xcfd   : > { %v2604_v11 = vpack.c.bf16 %v1874_v63, %v1873_v9  ;;  %v2607_v56 = vpack.c.bf16 %v1878_v6, %v1877_v41  ;;  %v4118_v12 = vpop.permute.xlu0 %2991  ;;  %vm4569_vm5 = vmmov %vm4567_vm3  ;;  %v2622_v62 = vpack.c.bf16 %v1836_v38, %v1835_v24  ;;  %v2984_v45 = vunpack.i.h.bf16 %v4116_v54 }
 0xcfe   : > { %v1840_v53 = vsel %vm4569_vm5, %v2974_v18, %v2964_v2  ;;  %vm4570_vm1 = vmmov %vm4567_vm3  ;;  %v2994_v4 = vunpack.i.h.bf16 %v4118_v12  ;;  %v2993_v17 = vunpack.i.l.bf16 %v4118_v12  ;;  %v2983_v28 = vunpack.i.l.bf16 %v4116_v54 }
 0xcff   : > { %2605 = vmatprep.subr.msk.bf16.mxu0 %vm4561_vm7, %v2604_v11  ;;  %v1839_v8 = vsel %vm4570_vm1, %v2973_v16, %v2963_v57  ;;  %vm4571_vm2 = vnez %v4504_v33  ;;  %vm4572_vm11 = vnez %v4510_v46  ;;  %vm4573_vm9 = vcmp.lt.s32.totalorder %v3365_v10, 112 }
 0xd00   : > { %2608 = vmatpush1.bf16.msk.msra.mxu0 %vm4562_vm0, %v2607_v56  ;;  %v2997_v60 = vpop.permute.xlu1 %2996  ;;  %v2625_v41 = vpack.c.bf16 %v1840_v53, %v1839_v8  ;;  %v2056_v12 = vsel %vm4573_vm9, %v2984_v45, %v2994_v4  ;;  %vm4574_vm8 = vmmov %vm4573_vm9  ;;  %vm4589_vm9 = vcmp.lt.s32.totalorder %v3365_v10, 111 }
 0xd01   : > { %v3007_v23 = vpop.permute.xlu0 %3006  ;;  %v2999_v20 = vunpack.i.h.bf16 %v2997_v60  ;;  %v2998_v25 = vunpack.i.l.bf16 %v2997_v60  ;;  %2611 = vmatprep.subr.msk.bf16.mxu0 %vm4561_vm7, %v2610_v30  ;;  %v2060_v54 = vsel %vm4574_vm8, %v2994_v4, %v2984_v45  ;;  %vm4575_vm12 = vmmov %vm4574_vm8 }
 0xd02   : > { %v3009_v35 = vunpack.i.h.bf16 %v3007_v23  ;;  %v3008_v27 = vunpack.i.l.bf16 %v3007_v23  ;;  %v2059_v7 = vsel %vm4575_vm12, %v2993_v17, %v2983_v28  ;;  %vm4576_vm10 = vmmov %vm4574_vm8 }
 0xd03   : > { %vm4577_vm7 = vmmov %vm4574_vm8  ;;  %v2634_v24 = vpack.c.bf16 %v2060_v54, %v2059_v7 }
 0xd04   : > { %v1838_v37 = vsel %vm4565_vm14, %v2999_v20, %v3009_v35  ;;  %v1842_v40 = vsel %vm4566_vm6, %v3009_v35, %v2999_v20  ;;  %v1837_v0 = vsel %vm4567_vm3, %v2998_v25, %v3008_v27  ;;  %v1841_v1 = vsel %vm4568_vm15, %v3008_v27, %v2998_v25  ;;  %2614 = vmatpush1.bf16.msk.msra.mxu0 %vm4562_vm0, %v2613_v26  ;;  %v4146_v42 = vpop.permute.xlu1 %3001  ;;  %vm4578_vm0 = vmmov %vm4577_vm7 }
 0xd05   : > { %v2616_v52 = vpack.c.bf16 %v1838_v37, %v1837_v0  ;;  %v2619_v29 = vpack.c.bf16 %v1842_v40, %v1841_v1  ;;  %v4148_v31 = vpop.permute.xlu0 %3011  ;;  %vm4579_vm13 = vmmov %vm4578_vm0  ;;  %v3004_v26 = vunpack.i.h.bf16 %v4146_v42  ;;  %v3003_v46 = vunpack.i.l.bf16 %v4146_v42 }
 0xd06   : > { %v3014_v25 = vunpack.i.h.bf16 %v4148_v31  ;;  %vm4580_vm4 = vmmov %vm4578_vm0  ;;  %v3013_v37 = vunpack.i.l.bf16 %v4148_v31  ;;  %vm4581_vm14 = vnez %v4460_v5  ;;  %vm4582_vm6 = vcmp.lt.s32.totalorder %v3365_v10, 113 }
 0xd07   : > { %2617 = vmatprep.subr.msk.bf16.mxu0 %vm4571_vm2, %v2616_v52  ;;  %v2055_v38 = vsel %vm4580_vm4, %v2983_v28, %v2993_v17  ;;  %vm4583_vm3 = vmmov %vm4582_vm6  ;;  %vm4584_vm15 = vnez %v4462_v13  ;;  %vm4596_vm4 = vnez %v4512_v34  ;;  %v3081_v34 = vld [vmem:[%s4384_s9 + $0x8] ss:$12 sps:$4 sm:$0xff]  }
 0xd08   : > { %2620 = vmatpush1.bf16.msk.msra.mxu0 %vm4572_vm11, %v2619_v29  ;;  %v3017_v44 = vpop.permute.xlu1 %3016  ;;  %v2637_v42 = vpack.c.bf16 %v2056_v12, %v2055_v38  ;;  %vm4585_vm5 = vmmov %vm4583_vm3 }
 0xd09   : > { %v3022_v63 = vpop.permute.xlu0 %3021  ;;  %v3019_v6 = vunpack.i.h.bf16 %v3017_v44  ;;  %v3018_v9 = vunpack.i.l.bf16 %v3017_v44  ;;  %2623 = vmatprep.subr.msk.bf16.mxu0 %vm4571_vm2, %v2622_v62  ;;  %v2024_v31 = vsel %vm4585_vm5, %v3014_v25, %v3004_v26  ;;  %vm4586_vm1 = vmmov %vm4583_vm3  ;;  %vm4601_vm5 = vnez %v4470_v39 }
 0xd0a   : > { %v3024_v11 = vunpack.i.h.bf16 %v3022_v63  ;;  %v3023_v56 = vunpack.i.l.bf16 %v3022_v63  ;;  %v2023_v4 = vsel %vm4586_vm1, %v3013_v37, %v3003_v46  ;;  %vm4587_vm2 = vmmov %vm4586_vm1 }
 0xd0b   : > { %vm4590_vm8 = vmmov %vm4589_vm9  ;;  %v2646_v13 = vpack.c.bf16 %v2024_v31, %v2023_v4 }
 0xd0c   : > { %v2058_v21 = vsel %vm4576_vm10, %v3019_v6, %v3024_v11  ;;  %v2062_v30 = vsel %vm4577_vm7, %v3024_v11, %v3019_v6  ;;  %v2057_v33 = vsel %vm4578_vm0, %v3018_v9, %v3023_v56  ;;  %v2061_v18 = vsel %vm4579_vm13, %v3023_v56, %v3018_v9  ;;  %2626 = vmatpush1.bf16.msk.msra.mxu0 %vm4572_vm11, %v2625_v41  ;;  %v3027_v16 = vpop.permute.xlu1 %3026  ;;  %vm4588_vm11 = vmmov %vm4586_vm1 }
 0xd0d   : > { %v2628_v2 = vpack.c.bf16 %v2062_v30, %v2061_v18  ;;  %v2631_v57 = vpack.c.bf16 %v2058_v21, %v2057_v33  ;;  %v3032_v60 = vpop.permute.xlu0 %3031  ;;  %v3029_v23 = vunpack.i.h.bf16 %v3027_v16  ;;  %v3028_v20 = vunpack.i.l.bf16 %v3027_v16  ;;  %vm4591_vm12 = vmmov %vm4590_vm8 }
 0xd0e   : > { %v3034_v35 = vunpack.i.h.bf16 %v3032_v60  ;;  %v3033_v27 = vunpack.i.l.bf16 %v3032_v60  ;;  %vm4592_vm10 = vmmov %vm4590_vm8  ;;  %vm4593_vm7 = vnez %v4466_v19 }
 0xd0f   : > { %2629 = vmatprep.subr.msk.bf16.mxu0 %vm4581_vm14, %v2628_v2  ;;  %vm4594_vm0 = vmmov %vm4586_vm1  ;;  %vm4602_vm1 = vnez %v4515_v32 }
 0xd10   : > { %v2026_v40 = vsel %vm4582_vm6, %v3034_v35, %v3029_v23  ;;  %v2025_v0 = vsel %vm4583_vm3, %v3033_v27, %v3028_v20  ;;  %2632 = vmatpush2.bf16.msk.msra.mxu0 %vm4584_vm15, %v2631_v57  ;;  %v3037_v1 = vpop.permute.xlu1 %3036  ;;  %v2022_v17 = vsel %vm4587_vm2, %v3029_v23, %v3034_v35  ;;  %v2021_v45 = vsel %vm4588_vm11, %v3028_v20, %v3033_v27  ;;  %vm4595_vm13 = vmmov %vm4594_vm0 }
 0xd11   : > { %v3047_v52 = vpop.permute.xlu0 %3046  ;;  %v3039_v29 = vunpack.i.h.bf16 %v3037_v1  ;;  %v3038_v53 = vunpack.i.l.bf16 %v3037_v1  ;;  %2635 = vmatprep.subr.msk.bf16.mxu0 %vm4581_vm14, %v2634_v24  ;;  %v2640_v28 = vpack.c.bf16 %v2026_v40, %v2025_v0  ;;  %v2643_v7 = vpack.c.bf16 %v2022_v17, %v2021_v45  ;;  %vm4597_vm14 = vmmov %vm4590_vm8  ;;  %v3152_v40 = vld [vmem:[%s3354_s24 + $0x8] sm:$0xff]  ;;  %v3153_v17 = vld [vmem:[%s3354_s24 + $0x10] sm:$0xff] }
 0xd12   : > { %v3049_v8 = vunpack.i.h.bf16 %v3047_v52  ;;  %v3048_v62 = vunpack.i.l.bf16 %v3047_v52  ;;  %v2020_v33 = vsel %vm4594_vm0, %v3004_v26, %v3014_v25  ;;  %v2019_v18 = vsel %vm4595_vm13, %v3003_v46, %v3013_v37  ;;  %vm4598_vm6 = vmmov %vm4590_vm8  ;;  %v3151_v46 = vld [vmem:[%s3354_s24 + $0x18] sm:$0xff]  ;;  %v3154_v45 = vld [vmem:[%s3354_s24] sm:$0xff]  ;;  %s3159_s24 = sshll.u32 %s3228_s0, 4  ;;  %s3160_s24 = int_to_ptr.vmem [resolvable:$false] %s3159_s24 }
 0xd13   : > { %vm4599_vm3 = vmmov %vm4598_vm6  ;;  %v2649_v38 = vpack.c.bf16 %v2020_v33, %v2019_v18  ;;  %v2290_v0 = vpack.c.bf16 %v3151_v46, %v3152_v40  ;;  %vm4603_vm2 = vcmp.lt.s32.totalorder %v3365_v10, 127  ;;  %v3083_v10 = vld [vmem:[%s4384_s9] ss:$12 sps:$4 sm:$0xff]   ;;  %s3161_s4 = scalar_lea.vmem %s3160_s24, 2048  ;;  %p3162_p0 = scmp.lt.s32.totalorder %s4329_s30, %s3160_s24 }
 0xd14   : > { %v2094_v5 = vsel %vm4589_vm9, %v3039_v29, %v3049_v8  ;;  %v2098_v44 = vsel %vm4590_vm8, %v3049_v8, %v3039_v29  ;;  %v2093_v63 = vsel %vm4591_vm12, %v3038_v53, %v3048_v62  ;;  %v2097_v6 = vsel %vm4592_vm10, %v3048_v62, %v3038_v53  ;;  %2638 = vmatpush2.bf16.msk.msra.mxu0 %vm4584_vm15, %v2637_v42  ;;  %v3042_v9 = vpop.permute.xlu1 %3041  ;;  %vm4600_vm15 = vmmov %vm4599_vm3  ;;  %p3163_p1 = scmp.lt.s32.totalorder %s3161_s4, %s3155_s1 }
 0xd15   : > { %v2664_v41 = vpack.c.bf16 %v2098_v44, %v2097_v6  ;;  %v2667_v11 = vpack.c.bf16 %v2094_v5, %v2093_v63  ;;  %v3052_v56 = vpop.permute.xlu0 %3051  ;;  %v3044_v12 = vunpack.i.h.bf16 %v3042_v9  ;;  %v3043_v54 = vunpack.i.l.bf16 %v3042_v9  ;;  %2641 = vmatprep.subr.msk.bf16.mxu0 %vm4593_vm7, %v2640_v28  ;;  %vm4604_vm11 = vmmov %vm4603_vm2 }
 0xd16   : > { %v3054_v21 = vunpack.i.h.bf16 %v3052_v56  ;;  %v3053_v30 = vunpack.i.l.bf16 %v3052_v56  ;;  %vm4605_vm9 = vmmov %vm4603_vm2  ;;  %v2289_v28 = vpack.c.bf16 %v3153_v17, %v3154_v45  ;;  %vm4607_vm12 = vnez %v4474_v55  ;;  %v3086_v55 = vld [vmem:[%s4386_s11] sm:$0xff]   ;;  %p3164_p2 = por %p3163_p1, %p3162_p0 }
 0xd17   : > { %2665 = vmatprep.subr.msk.bf16.mxu1 %vm4596_vm4, %v2664_v41  ;;  %vm4606_vm8 = vmmov %vm4603_vm2 }
 0xd18   : > { %v2092_v16 = vsel %vm4597_vm14, %v3044_v12, %v3054_v21  ;;  %v2096_v2 = vsel %vm4598_vm6, %v3054_v21, %v3044_v12  ;;  %v2091_v57 = vsel %vm4599_vm3, %v3043_v54, %v3053_v30  ;;  %v2095_v60 = vsel %vm4600_vm15, %v3053_v30, %v3043_v54  ;;  %2644 = vmatpush2.bf16.msk.msra.mxu0 %vm4601_vm5, %v2643_v7  ;;  %v3057_v23 = vpop.permute.xlu1 %3056  ;;  %vm4608_vm10 = vmmov %vm4603_vm2  ;;  %p3165_p3 = pnand %p3164_p2, %p3158_p13 }
 0xd19   : > { %v2670_v20 = vpack.c.bf16 %v2096_v2, %v2095_v60  ;;  %v2673_v25 = vpack.c.bf16 %v2092_v16, %v2091_v57  ;;  %2668 = vmatpush1.bf16.msk.msra.mxu1 %vm4602_vm1, %v2667_v11  ;;  %v3067_v26 = vpop.permute.xlu0 %3066  ;;  %v3059_v35 = vunpack.i.h.bf16 %v3057_v23  ;;  %v3058_v27 = vunpack.i.l.bf16 %v3057_v23  ;;  %2647 = vmatprep.subr.msk.bf16.mxu0 %vm4593_vm7, %v2646_v13  ;;  %vm4609_vm7 = vmmov %vm4603_vm2  ;;  %v3082_v11 = vld [vmem:[%s4384_s9 + $0x20] ss:$12 sps:$4 sm:$0xff]  }
 0xd1a   : > { %v3069_v24 = vunpack.i.h.bf16 %v3067_v26  ;;  %v3068_v37 = vunpack.i.l.bf16 %v3067_v26  ;;  %vm4610_vm0 = vmmov %vm4603_vm2  ;;  %vm4613_vm14 = vnez %v4476_v61  ;;  %v3087_v61 = vld [vmem:[%s4384_s9 + $0x1c] ss:$12 sps:$4 sm:$0xff]   ;;  %vm4615_vm3 = vcmask 130048  }
 0xd1b   : > { %2671 = vmatprep.subr.msk.bf16.mxu1 %vm4596_vm4, %v2670_v20  ;;  %vm4611_vm13 = vmmov %vm4610_vm0  ;;  %vm4612_vm4 = vcmask 261120  }
 0xd1c   : > { %v1986_v1 = vsel %vm4603_vm2, %v3059_v35, %v3069_v24  ;;  %v1990_v52 = vsel %vm4604_vm11, %v3069_v24, %v3059_v35  ;;  %v1985_v19 = vsel %vm4605_vm9, %v3058_v27, %v3068_v37  ;;  %v1989_v29 = vsel %vm4606_vm8, %v3068_v37, %v3058_v27  ;;  %2650 = vmatpush2.bf16.msk.msra.mxu0 %vm4601_vm5, %v2649_v38  ;;  %v3062_v53 = vpop.permute.xlu1 %3061  ;;  %vm4614_vm6 = vmmov %vm4612_vm4 }
 0xd1d   : > { %v2652_v42 = vpack.c.bf16 %v1990_v52, %v1989_v29  ;;  %v2655_v31 = vpack.c.bf16 %v1986_v1, %v1985_v19  ;;  %2674 = vmatpush1.bf16.msk.msra.mxu1 %vm4602_vm1, %v2673_v25  ;;  %v3072_v8 = vpop.permute.xlu0 %3071  ;;  %v3064_v62 = vunpack.i.h.bf16 %v3062_v53  ;;  %v3063_v4 = vunpack.i.l.bf16 %v3062_v53  ;;  %vm4616_vm15 = vmmov %vm4615_vm3 }
 0xd1e   : > { %v3074_v5 = vunpack.i.h.bf16 %v3072_v8  ;;  %v3073_v44 = vunpack.i.l.bf16 %v3072_v8  ;;  %2345 = vmatprep.subr.bf16.mxu1 %v2290_v0 }
 0xd1f   : > { %2653 = vmatprep.subr.msk.bf16.mxu0 %vm4607_vm12, %v2652_v42 }
 0xd20   : > { %v1984_v39 = vsel %vm4608_vm10, %v3064_v62, %v3074_v5  ;;  %v1988_v63 = vsel %vm4609_vm7, %v3074_v5, %v3064_v62  ;;  %v1983_v32 = vsel %vm4610_vm0, %v3063_v4, %v3073_v44  ;;  %v1987_v6 = vsel %vm4611_vm13, %v3073_v44, %v3063_v4  ;;  %2675 = vmatmul.mubr.msk.bf16.vlgmr.msra.gmra.mxu1 %vm4612_vm4, %v3081_v34 }
 0xd21   : > { %v2658_v9 = vpack.c.bf16 %v1988_v63, %v1987_v6  ;;  %v2661_v41 = vpack.c.bf16 %v1984_v39, %v1983_v32  ;;  %2656 = vmatpush2.bf16.msk.msra.mxu0 %vm4613_vm14, %v2655_v31  ;;  %2274 = vmatprep.mubr.bf16.mxu1 %v3219_v22 }
 0xd22   : > { %2346 = vmatpush1.bf16.msra.mxu1 %v2289_v28 }
 0xd23   : > { %2659 = vmatprep.subr.msk.bf16.mxu0 %vm4607_vm12, %v2658_v9 }
 0xd25   : > { %2662 = vmatpush2.bf16.msk.msra.mxu0 %vm4613_vm14, %v2661_v41 }
 0xd26   : > { %2207 = vmatprep.subr.bf16.mxu0 %v1966_v36 }
 0xd28   : > { %2676 = vmatmul.mubr.msk.bf16.gmra.mxu1 %vm4614_vm6, %v3082_v11 }
 0xd29   : > { %2208 = vmatpush2.bf16.msra.mxu0 %v1965_v58  ;;  %2363 = vmatprep.mubr.bf16.mxu1 %v3219_v22  ;;  %v2126_v48 = vpop.permute.xlu1 %2125 }
 0xd2a   : > { %2209 = vmatprep.subr.bf16.mxu0 %v1964_v59 }
 0xd2d   : > { %2210 = vmatpush2.bf16.msra.mxu0 %v1963_v51  ;;  %v2136_v58 = vpop.permute.xlu1 %2135 }
 0xd30   : > { %2212 = vmatmul.mubr.bf16.vlgmr.msra.gmra.mxu0 %v3083_v10  ;;  %2679 = vmatmul.mubr.msk.bf16.vlgmr.msra.gmra.mxu1 %vm4615_vm3, %v3086_v55 }
 0xd31   : > { %2221 = vmatprep.mubr.bf16.mxu0 %v3087_v61  ;;  %2373 = vmatprep.mubr.bf16.mxu1 %v3219_v22  ;;  %v2131_v22 = vpop.permute.xlu0 %2130  ;;  %v2298_v7 = vpop.permute.xlu1 %2297 }
 0xd35   : > { %v2141_v56 = vpop.permute.xlu0 %2140  ;;  %v2308_v1 = vpop.permute.xlu1 %2307 }
 0xd38   : > { %2222 = vmatmul.mubr.bf16.gmra.mxu0 %v3089_v43  ;;  %2680 = vmatmul.mubr.msk.bf16.gmra.mxu1 %vm4616_vm15, %v3090_v47 }
 0xd39   : > { %v2303_v60 = vpop.permute.xlu0 %2302 }
 0xd3d   : > { %v2313_v28 = vpop.permute.xlu0 %2312 }
 0xde0   : > { %v2266_v14 = vpop.f32.mrf.mxu1 }
 0xde2   : > { %v2268_v15 = vpop.f32.mrf.mxu1 }
 0xde4   : > { %v2270_v3 = vpop.f32.mrf.mxu1 }
 0xde6   : > { %v2272_v49 = vpop.f32.mrf.mxu1 }
 0xde8   : > { %v2276_v50 = vpop.f32.mrf.mxu1 }
 0xdea   : > { %v2278_v36 = vpop.f32.mrf.mxu1 }
 0xdec   : > { %v2280_v59 = vpop.f32.mrf.mxu1 }
 0xdee   : > { %v2282_v51 = vpop.f32.mrf.mxu1 }
 0xdf0   : > { %v2213_v12 = vpop.f32.mrf.mxu0  ;;  %v2365_v54 = vpop.f32.mrf.mxu1 }
 0xdf1   : > { %v2214_v21 = vadd.f32 %v2213_v12, %v2126_v48  ;;  %v2366_v13 = vadd.f32 %v2365_v54, %v2298_v7 }
 0xdf2   : > { %v2215_v30 = vpop.f32.mrf.mxu0  ;;  %v2367_v33 = vpop.f32.mrf.mxu1 }
 0xdf3   : > { %v2267_v18 = vadd.f32 %v2266_v14, %v2214_v21  ;;  %v2216_v16 = vadd.f32 %v2215_v30, %v2126_v48  ;;  %v2368_v25 = vadd.f32 %v2367_v33, %v2298_v7 }
 0xdf4   : > { %v2217_v2 = vpop.f32.mrf.mxu0  ;;  %v2369_v57 = vpop.f32.mrf.mxu1 }
 0xdf5   : > { %v2384_v23 = vadd.f32 %v2366_v13, %v2267_v18  ;;  %v2269_v20 = vadd.f32 %v2268_v15, %v2216_v16  ;;  %v2218_v26 = vadd.f32 %v2217_v2, %v2131_v22  ;;  %v2370_v37 = vadd.f32 %v2369_v57, %v2303_v60 }
 0xdf6   : > { %v2219_v35 = vpop.f32.mrf.mxu0  ;;  %v2371_v27 = vpop.f32.mrf.mxu1 }
 0xdf7   : > { %2392 = vst [vmem:[%s4313_s15] sm:$0xff] %v2384_v23  ;;  %v2385_v38 = vadd.f32 %v2368_v25, %v2269_v20  ;;  %v2271_v24 = vadd.f32 %v2270_v3, %v2218_v26  ;;  %v2220_v46 = vadd.f32 %v2219_v35, %v2131_v22  ;;  %v2372_v29 = vadd.f32 %v2371_v27, %v2303_v60 }
 0xdf8   : > { %v2223_v40 = vpop.f32.mrf.mxu0  ;;  %v2375_v0 = vpop.f32.mrf.mxu1 }
 0xdf9   : > { %2393 = vst [vmem:[%s4313_s15 + $0x8] sm:$0xff] %v2385_v38  ;;  %v2386_v52 = vadd.f32 %v2370_v37, %v2271_v24  ;;  %v2273_v19 = vadd.f32 %v2272_v49, %v2220_v46  ;;  %v2224_v53 = vadd.f32 %v2223_v40, %v2136_v58  ;;  %v2376_v62 = vadd.f32 %v2375_v0, %v2308_v1 }
 0xdfa   : > { %v2225_v34 = vpop.f32.mrf.mxu0  ;;  %v2377_v42 = vpop.f32.mrf.mxu1 }
 0xdfb   : > { %2394 = vst [vmem:[%s4313_s15 + $0x10] sm:$0xff] %v2386_v52  ;;  %v2387_v31 = vadd.f32 %v2372_v29, %v2273_v19  ;;  %v2277_v8 = vadd.f32 %v2276_v50, %v2224_v53  ;;  %v2226_v4 = vadd.f32 %v2225_v34, %v2136_v58  ;;  %v2378_v39 = vadd.f32 %v2377_v42, %v2308_v1 }
 0xdfc   : > { %v2227_v17 = vpop.f32.mrf.mxu0  ;;  %v2379_v45 = vpop.f32.mrf.mxu1 }
 0xdfd   : > { %2395 = vst [vmem:[%s4313_s15 + $0x18] sm:$0xff] %v2387_v31  ;;  %v2388_v5 = vadd.f32 %v2376_v62, %v2277_v8  ;;  %v2279_v44 = vadd.f32 %v2278_v36, %v2226_v4  ;;  %v2228_v63 = vadd.f32 %v2227_v17, %v2141_v56  ;;  %v2380_v11 = vadd.f32 %v2379_v45, %v2313_v28 }
 0xdfe   : > { %v2229_v32 = vpop.f32.mrf.mxu0  ;;  %v2381_v6 = vpop.f32.mrf.mxu1 }
 0xdff   : > { %2396 = vst [vmem:[%s4313_s15 + $0x20] sm:$0xff] %v2388_v5  ;;  %v2389_v9 = vadd.f32 %v2378_v39, %v2279_v44  ;;  %v2281_v41 = vadd.f32 %v2280_v59, %v2228_v63  ;;  %v2230_v10 = vadd.f32 %v2229_v32, %v2141_v56  ;;  %v2382_v43 = vadd.f32 %v2381_v6, %v2313_v28 }
 0xe01   : > { %2397 = vst [vmem:[%s4313_s15 + $0x28] sm:$0xff] %v2389_v9  ;;  %v2390_v55 = vadd.f32 %v2380_v11, %v2281_v41  ;;  %v2283_v61 = vadd.f32 %v2282_v51, %v2230_v10 }
 0xe03   : > { %2398 = vst [vmem:[%s4313_s15 + $0x30] sm:$0xff] %v2390_v55  ;;  %v2391_v47 = vadd.f32 %v2382_v43, %v2283_v61 }
 0xe05   : > { %2399 = vst [vmem:[%s4313_s15 + $0x38] sm:$0xff] %v2391_v47 }
 0xe06   : > { %3168 = shalt.err (!%p3165_p3)
}
 0xe07   : > { %s3169_s3 = scalar_lea.hbm %s4326_s21, 1024  ;;  %s3173_s16 = scalar_lea.hbm %s4388_s13, 2048 }
 0xe08   : > { %p3170_p4 = scmp.ne.s32.totalorder %s4326_s21, %s3169_s3  ;;  %p3174_p9 = scmp.lt.s32.totalorder %s4326_s21, %s4388_s13 }
 0xe09   : > { %p3175_p10 = scmp.lt.s32.totalorder %s3173_s16, %s3169_s3 }
 0xe0a   : > { %p3171_p7 = pnand %p3170_p4, %p3338_p5 }
 0xe0b   : > { %p3176_p11 = por %p3175_p10, %p3174_p9 }
 0xe0c   : > { %p3172_p8 = pneg %p3171_p7 }
 0xe0e   : > { %p3177_p12 = pnand %p3176_p11, %p3172_p8 }
 0xe10   : > { %3180 = shalt.err (!%p3177_p12)
}
 0xe11   : > { %s3229_s1 = smov 256  }
 0xe12   : > { %2782 = dma.vmem_to_hbm [thread:$0]  (%p3338_p5), %s4329_s30, 1024, %s4326_s21, %s4334_s29, %s3229_s1, %s3229_s1, %s4529_s23  }
 0xe13 PF: > { %p2788_p13 = scmp.ge.s32.totalorder %s3215_s28, 2  ;;  %s2429_s24 = sand.u32 1, %s3203_s25  }
 0xe14   : > { %s2430_s4 = scalar_lea.sflag [#allocation3], %s2429_s24 }
 0xe15   : > { %p2785_p0 = pnand %p2788_p13, %p3342_p6 }
 0xe17   : > { %p2786_p1 = pneg %p2785_p0 }
 0xe19   : > { %3198 = dma.done.wait (%p2786_p1), %s2430_s4, 1024  }
 0xe1a   : > { %3200 = vsyncadd (%p2786_p1), %s2430_s4, 4294966272  ;;  %p23_p2 = scmp.ge.s32.totalorder %s3325_s14, 4   ;;  %s4617_s25 = smov %s3207_s26 }
 0xe1b   : > { %s4618_s26 = smov %s3211_s27  ;;  %s4619_s27 = smov %s3336_s17 }
 0xe1c   : > { %s4620_s28 = smov %s3325_s14  ;;  %25 = sbr.rel (!%p23_p2) target bundleno = 8 (0x8), region = 107 }
 0xe21   :  { %2435 = vsyncpa [#allocation3], 1 }
 0xe22   :  { %2437 = vsyncpa [#allocation3 + $0x1], 1 }

</bundles_post_ra>
